<compile_context>
chip_gen: v6e
topology: v6e:2x2x1
jax: 0.10.0
libtpu: 0.0.40
codegen_flags: <defaults>
</compile_context>

<pallas_src>
import numpy as np
import jax
import jax.numpy as jnp
from jax.experimental import pallas as pl
from jax.experimental.pallas import tpu as pltpu

FEATURE_DIM = 16             # PREF feature_dim (= MLP input dim)
HIDDEN_DIM = 64              # MLP hidden
LINEAR_FREQS = (128, 128, 128)
REDUCED_FREQS = (1, 1, 1)
N_AXES = 3
TILE_N = 4096                # points per grid step (sweep 4096-8192)


# ----------------------------- Pallas kernel ------------------------------- #
def neural_field_kernel(feat_ref, w1t_ref, b1_ref, w2_ref, b2_ref, o_ref):
    # feat_ref: (16, TILE_N) bf16  — transposed, lane-dense feature stream
    # w1t_ref:  (64, 16)     bf16  — W1^T (resident)
    # b1_ref:   (64, 1) f32, w2_ref: (64, 1) f32 (resident columns)
    # b2_ref:   (1, 1)  f32 in SMEM
    # o_ref:    (1, TILE_N)  f32  — lane-dense output row
    h = jnp.dot(w1t_ref[...], feat_ref[...],
                preferred_element_type=jnp.float32)          # (64, TILE_N) f32
    h = jnp.maximum(h + b1_ref[...], 0.0)                    # bias bcast along lanes
    # 64 -> 1 projection as a VPU multiply + sublane reduce (a width-1 MXU
    # output would waste nearly all of its lanes).
    o_ref[...] = jnp.sum(h * w2_ref[...], axis=0, keepdims=True) + b2_ref[0, 0]


def neural_field_pallas(feat_t, w1t, b1_col, w2_col, b2, *, tile_n=TILE_N):
    d, n_pad = feat_t.shape
    assert n_pad % tile_n == 0, "caller pads the point axis"
    hid = w1t.shape[0]
    grid = (n_pad // tile_n,)
    out = pl.pallas_call(
        neural_field_kernel,
        out_shape=jax.ShapeDtypeStruct((1, n_pad), jnp.float32),
        grid=grid,
        in_specs=[
            pl.BlockSpec((d, tile_n), lambda i: (0, i)),          # feat^T tile (streamed)
            pl.BlockSpec((hid, d), lambda i: (0, 0)),             # W1^T (resident)
            pl.BlockSpec((hid, 1), lambda i: (0, 0)),             # b1 column (resident)
            pl.BlockSpec((hid, 1), lambda i: (0, 0)),             # w2 column (resident)
            pl.BlockSpec(memory_space=pltpu.MemorySpace.SMEM),    # b2 scalar
        ],
        out_specs=pl.BlockSpec((1, tile_n), lambda i: (0, i)),    # lane-dense row
        compiler_params=pltpu.CompilerParams(
            dimension_semantics=("parallel",)),
    )(feat_t, w1t, b1_col, w2_col, b2)
    return out                                                    # (1, n_pad)


# ------------------------------ JAX glue ----------------------------------- #
def init_params(key):
    ks = jax.random.split(key, 8)
    phasors = []
    for a in range(N_AXES):
        other = [j for j in range(N_AXES) if j != a]
        shape = (FEATURE_DIM, REDUCED_FREQS[a],
                 LINEAR_FREQS[other[0]], LINEAR_FREQS[other[1]])
        re = jax.random.normal(ks[a], shape, jnp.float32)
        im = jax.random.normal(jax.random.fold_in(ks[a], 1), shape, jnp.float32)
        phasors.append((1e-3 * (re + 1j * im)).astype(jnp.complex64))
    lim1 = 1.0 / np.sqrt(FEATURE_DIM)
    lim2 = 1.0 / np.sqrt(HIDDEN_DIM)
    w1 = jax.random.uniform(ks[3], (FEATURE_DIM, HIDDEN_DIM), jnp.float32, -lim1, lim1)
    b1 = jax.random.uniform(ks[4], (1, HIDDEN_DIM), jnp.float32, -lim1, lim1)
    w2 = jax.random.uniform(ks[5], (HIDDEN_DIM, 1), jnp.float32, -lim2, lim2)
    b2 = jax.random.uniform(ks[6], (1, 1), jnp.float32, -lim2, lim2)
    return phasors, (w1, b1, w2, b2)


def prepare_planes(phasors):
    """Parameter-only work, hoisted out of the per-call forward.
    iFFT2 over the two full-resolution axes; reduced_freqs == 1 makes the
    numerical iFT over the reduced axis degenerate to Re() of the DC phasor."""
    planes = []
    for a in range(N_AXES):
        plane_c = jnp.fft.ifft2(phasors[a], axes=(-2, -1), norm="forward")  # (D,1,H,W)
        plane = jnp.real(plane_c)[:, 0]                                      # (D,H,W)
        planes.append(jnp.transpose(plane, (1, 2, 0)))                       # (H,W,D)
    return planes


def prepare_mlp(mlp):
    """One-time MLP weight re-layout / cast for the kernel."""
    w1, b1, w2, b2 = mlp
    w1t = jnp.transpose(w1).astype(jnp.bfloat16)        # (64, 16) bf16
    b1_col = jnp.transpose(b1).astype(jnp.float32)      # (64, 1)
    w2_col = w2.astype(jnp.float32)                      # (64, 1)
    return w1t, b1_col, w2_col, b2.astype(jnp.float32)


def encode_features(x, planes):
    """x: (N,3) coords in [-1,1]; planes: 3 x (H,W,D) f32 (already iFFT'd).
    Returns the summed PREF feature (N, 16) in f32 (bilinear sample of each
    axis plane, align_corners=True, summed over the 3 planes)."""
    feat = jnp.zeros((x.shape[0], FEATURE_DIM), jnp.float32)
    for a in range(N_AXES):
        other = [j for j in range(N_AXES) if j != a]
        plane = planes[a]
        H, W, D = plane.shape
        u = jnp.clip((x[:, other[0]] + 1.0) * 0.5 * (H - 1), 0.0, H - 1)
        v = jnp.clip((x[:, other[1]] + 1.0) * 0.5 * (W - 1), 0.0, W - 1)
        u0 = jnp.floor(u)
        v0 = jnp.floor(v)
        au = u - u0
        av = v - v0
        u0i = u0.astype(jnp.int32)
        v0i = v0.astype(jnp.int32)
        u1i = jnp.minimum(u0i + 1, H - 1)
        v1i = jnp.minimum(v0i + 1, W - 1)
        flat = plane.reshape(H * W, D)
        c00 = jnp.take(flat, u0i * W + v0i, axis=0)
        c01 = jnp.take(flat, u0i * W + v1i, axis=0)
        c10 = jnp.take(flat, u1i * W + v0i, axis=0)
        c11 = jnp.take(flat, u1i * W + v1i, axis=0)
        w00 = ((1.0 - au) * (1.0 - av))[:, None]
        w01 = ((1.0 - au) * av)[:, None]
        w10 = (au * (1.0 - av))[:, None]
        w11 = (au * av)[:, None]
        # Blend + sum in f32 in the wrapper (fused into the gather epilogue);
        # only the 16-wide summed feature reaches HBM / the kernel.
        feat = feat + c00 * w00 + c01 * w01 + c10 * w10 + c11 * w11
    return feat                                           # (N, 16) f32


def neural_field_forward(x, planes, mlp_prepared, *, tile_n=TILE_N):
    n = x.shape[0]
    n_pad = pl.cdiv(n, tile_n) * tile_n
    if n_pad != n:
        # Pad the cheap (N,3) coordinate array, NOT the materialized feature
        # stream.  Padded rows compute garbage (~relu(b1)·w2 + b2) in the
        # kernel and are sliced off below — do not treat them as zeros.
        x = jnp.pad(x, ((0, n_pad - n), (0, 0)))
    feat_t = encode_features(x, planes).T.astype(jnp.bfloat16)   # (16, n_pad) bf16
    w1t, b1_col, w2_col, b2 = mlp_prepared
    out_row = neural_field_pallas(feat_t, w1t, b1_col, w2_col, b2,
                                  tile_n=tile_n)                 # (1, n_pad) f32
    return out_row[0, :n, None]                                  # (n, 1)


def reference_forward(x, planes, mlp):
    """Pure-JAX f32 reference of the same forward pass."""
    feat = encode_features(x, planes)
    w1, b1, w2, b2 = mlp
    h = jnp.maximum(feat @ w1 + b1, 0.0)
    return h @ w2 + b2


# -------------------------------- main -------------------------------------- #
if __name__ == "__main__":
    key = jax.random.PRNGKey(0)
    k_x, k_p = jax.random.split(key)
    phasors, mlp = init_params(k_p)

    # One-time (parameter-only) preparation, outside the jitted forward.
    planes = prepare_planes(phasors)
    mlp_prepared = prepare_mlp(mlp)

    N = 5000       # not a multiple of TILE_N -> exercises padding; 2 grid steps
    x = jax.random.uniform(k_x, (N, 3), jnp.float32, minval=-1.0, maxval=1.0)

    fwd = jax.jit(neural_field_forward)
    out = jax.block_until_ready(fwd(x, planes, mlp_prepared))
    assert out.shape == (N, 1)

    ref = reference_forward(x, planes, mlp)
    np.testing.assert_allclose(np.asarray(out), np.asarray(ref),
                               rtol=5e-2, atol=5e-3)

    print("KERNEL_OK")
</pallas_src>

<mosaic_0001>
module attributes {stable_mosaic.version = 11 : i64} {
  func.func @neural_field_kernel(%arg0: i32, %arg1: memref<16x4096xbf16, #tpu.memory_space<vmem>>, %arg2: memref<64x16xbf16, #tpu.memory_space<vmem>>, %arg3: memref<64x1xf32, #tpu.memory_space<vmem>>, %arg4: memref<64x1xf32, #tpu.memory_space<vmem>>, %arg5: memref<1x1xf32, #tpu.memory_space<smem>>, %arg6: memref<1x4096xf32, #tpu.memory_space<vmem>>) attributes {dimension_semantics = [#tpu.dimension_semantics<parallel>], iteration_bounds = array<i64: 2>, scalar_prefetch = 0 : i64, scratch_operands = 0 : i64, tpu.core_type = #tpu.core_type<tc>, window_params = [{transform_indices = @transform_0, window_bounds = array<i64: 16, 4096>}, {pipeline_mode = #tpu.pipeline_mode<synchronous>, transform_indices = @transform_1, window_bounds = array<i64: 64, 16>}, {pipeline_mode = #tpu.pipeline_mode<synchronous>, transform_indices = @transform_2, window_bounds = array<i64: 64, 1>}, {pipeline_mode = #tpu.pipeline_mode<synchronous>, transform_indices = @transform_3, window_bounds = array<i64: 64, 1>}, {transform_indices = @transform_4, window_bounds = array<i64: 1, 1>}, {transform_indices = @transform_5, window_bounds = array<i64: 1, 4096>}]} {
    %c0 = arith.constant 0 : index
    %c0_0 = arith.constant 0 : index
    %0 = vector.load %arg2[%c0, %c0_0] : memref<64x16xbf16, #tpu.memory_space<vmem>>, vector<64x16xbf16>
    %c0_1 = arith.constant 0 : index
    %c0_2 = arith.constant 0 : index
    %1 = vector.load %arg1[%c0_1, %c0_2] : memref<16x4096xbf16, #tpu.memory_space<vmem>>, vector<16x4096xbf16>
    %cst = arith.constant dense<0.000000e+00> : vector<64x4096xf32>
    %2 = tpu.matmul %0, %1, %cst {dimension_numbers = #tpu.dot_dimension_numbers<[1], [0], [0], [1], [0, 0, 1, 1], [], []>} : vector<64x16xbf16>, vector<16x4096xbf16>, vector<64x4096xf32> -> vector<64x4096xf32>
    %c0_3 = arith.constant 0 : index
    %c0_4 = arith.constant 0 : index
    %3 = vector.load %arg3[%c0_3, %c0_4] : memref<64x1xf32, #tpu.memory_space<vmem>>, vector<64x1xf32>
    %4 = vector.broadcast %3 : vector<64x1xf32> to vector<64x4096xf32>
    %5 = arith.addf %2, %4 : vector<64x4096xf32>
    %cst_5 = arith.constant 0.000000e+00 : f32
    %6 = vector.broadcast %cst_5 : f32 to vector<64x4096xf32>
    %7 = arith.maximumf %5, %6 : vector<64x4096xf32>
    %c0_6 = arith.constant 0 : index
    %c0_7 = arith.constant 0 : index
    %8 = vector.load %arg4[%c0_6, %c0_7] : memref<64x1xf32, #tpu.memory_space<vmem>>, vector<64x1xf32>
    %9 = vector.broadcast %8 : vector<64x1xf32> to vector<64x4096xf32>
    %10 = arith.mulf %7, %9 : vector<64x4096xf32>
    %cst_8 = arith.constant dense<0.000000e+00> : vector<4096xf32>
    %11 = vector.multi_reduction <add>, %10, %cst_8 [0] : vector<64x4096xf32> to vector<4096xf32>
    %12 = vector.shape_cast %11 : vector<4096xf32> to vector<1x4096xf32>
    %c0_9 = arith.constant 0 : index
    %c0_10 = arith.constant 0 : index
    %13 = memref.load %arg5[%c0_9, %c0_10] : memref<1x1xf32, #tpu.memory_space<smem>>
    %14 = vector.broadcast %13 : f32 to vector<1x4096xf32>
    %15 = arith.addf %12, %14 : vector<1x4096xf32>
    %c0_11 = arith.constant 0 : index
    %c0_12 = arith.constant 0 : index
    %16 = vector.load %arg6[%c0_11, %c0_12] : memref<1x4096xf32, #tpu.memory_space<vmem>>, vector<1x4096xf32>
    tpu.vector_store %arg6[%c0_11, %c0_12], %15 {strides = array<i32>} : memref<1x4096xf32, #tpu.memory_space<vmem>>, vector<1x4096xf32>,
    return
  }
  func.func @transform_0(%arg0: i32) -> (i32, i32) {
    %c0_i32 = arith.constant 0 : i32
    %c0_i32_0 = arith.constant 0 : i32
    return %c0_i32, %arg0 : i32, i32
  }
  func.func @transform_1(%arg0: i32) -> (i32, i32) {
    %c0_i32 = arith.constant 0 : i32
    %c0_i32_0 = arith.constant 0 : i32
    %c0_i32_1 = arith.constant 0 : i32
    return %c0_i32, %c0_i32_0 : i32, i32
  }
  func.func @transform_2(%arg0: i32) -> (i32, i32) {
    %c0_i32 = arith.constant 0 : i32
    %c0_i32_0 = arith.constant 0 : i32
    %c0_i32_1 = arith.constant 0 : i32
    return %c0_i32, %c0_i32_0 : i32, i32
  }
  func.func @transform_3(%arg0: i32) -> (i32, i32) {
    %c0_i32 = arith.constant 0 : i32
    %c0_i32_0 = arith.constant 0 : i32
    %c0_i32_1 = arith.constant 0 : i32
    return %c0_i32, %c0_i32_0 : i32, i32
  }
  func.func @transform_4(%arg0: i32) -> (i32, i32) {
    %c0_i32 = arith.constant 0 : i32
    %c0_i32_0 = arith.constant 0 : i32
    %c0_i32_1 = arith.constant 0 : i32
    return %c0_i32, %c0_i32_0 : i32, i32
  }
  func.func @transform_5(%arg0: i32) -> (i32, i32) {
    %c0_i32 = arith.constant 0 : i32
    %c0_i32_0 = arith.constant 0 : i32
    return %c0_i32, %arg0 : i32, i32
  }
}

</mosaic_0001>

<bundles_post_ra>
// kernel: neural_field_forward.1
= control target key start
LH: loop header
LB: loop body
LE: loop exit
PB: predicated region body
PF: predicated region fallthrough
CT: control target
= control target key end

     0   :  { %s4917_s0 = inlined_call_operand.vmem [shape: bf16[16,8192], index: 0, kind: input, shape index: {}]   ;;  %s4918_s1 = inlined_call_operand.vmem [shape: bf16[64,16], index: 1, kind: input, shape index: {}]   ;;  %s4919_s2 = inlined_call_operand.vmem [shape: f32[64,1], index: 2, kind: input, shape index: {}]   ;;  %s4920_s3 = inlined_call_operand.vmem [shape: f32[64,1], index: 3, kind: input, shape index: {}]   ;;  %s4921_s4 = inlined_call_operand.<no memory space> [shape: f32[1,1], index: 4, kind: input, shape index: {}]   ;;  %s4922_s5 = inlined_call_operand.vmem [shape: f32[1,8192], index: 5, kind: output, shape index: {}]  }
   0x1   :  { %10 = sst [smem:[#allocation2]] %s4921_s4 }
   0x2   :  { %s3264_s20 = smov 0   ;;  %s3266_s21 = smov 0  }
   0x3   :  { %s3268_s22 = smov 0  }
   0x4 LB: > { %s3060_s4 = sadd.s32 4294967295, %s3227_s22   ;;  %s3281_s23 = sadd.s32 1, %s3227_s22   ;;  %s3227_s22 = sphi %s3268_s22, %s5038_s22   ;;  %s3223_s21 = sphi %s3266_s21, %s5037_s21   ;;  %s3219_s20 = sphi %s3264_s20, %s5036_s20  }
   0x5   : > { %s20_s24 = ssub.s32 %s3227_s22, %s3281_s23  ;;  %s23_s25 = sadd.s32 1, %s3223_s21 }
   0x6   : > { %p21_p0 = scmp.eq.s32.totalorder %s20_s24, 0  ;;  %p30_p1 = scmp.ne.s32.totalorder %s3223_s21, %s3219_s20 }
   0x7   : > { %p31_p2 = scmp.eq.s32.totalorder %s3227_s22, 0  ;;  %p3063_p4 = scmp.ge.s32.totalorder %s3227_s22, 2 }
   0x8   : > { %s3290_s26 = scalar_select %p21_p0, %s3223_s21, %s23_s25  }
   0x9   : > { %p32_p3 = por %p31_p2, %p30_p1  ;;  %178 = sbr.rel (%p3063_p4) target bundleno = 34 (0x22), region = 32 }
   0xe   : > { %181 = sbr.rel (!%p32_p3) target bundleno = 34 (0x22), region = 36  ;;  %s183_s27 = sand.u32 (%p32_p3), 1, %s3223_s21  }
   0xf   : > { %s3172_s28 = sshll.u32 (%p32_p3), %s3227_s22, 7  ;;  %s3064_s29 = sshll.u32 (%p32_p3), %s183_s27, 8 }
  0x10   : > { %s3298_s7 = scalar_lea.vmem (%p32_p3), %s4917_s0, %s3172_s28  ;;  %s3303_s8 = scalar_lea.vmem (%p32_p3), [#allocation3], %s3064_s29 }
  0x11   : > { %v201_v0 = vld [vmem:[%s3298_s7] sm:$0xff] (%p32_p3)  ;;  %v203_v1 = vld [vmem:[%s3298_s7 + $0x8] sm:$0xff] (%p32_p3)  ;;  %v205_v2 = vld [vmem:[%s3298_s7 + $0x10] sm:$0xff] (%p32_p3) }
  0x12   : > { %202 = vst [vmem:[%s3303_s8] sm:$0xff] (%p32_p3), %v201_v0  ;;  %204 = vst [vmem:[%s3303_s8 + $0x8] sm:$0xff] (%p32_p3), %v203_v1  ;;  %v207_v3 = vld [vmem:[%s3298_s7 + $0x18] sm:$0xff] (%p32_p3)  ;;  %v209_v4 = vld [vmem:[%s3298_s7 + $0x20] sm:$0xff] (%p32_p3) }
  0x13   : > { %206 = vst [vmem:[%s3303_s8 + $0x10] sm:$0xff] %v205_v2  ;;  %v211_v5 = vld [vmem:[%s3298_s7 + $0x28] sm:$0xff]  ;;  %208 = vst [vmem:[%s3303_s8 + $0x18] sm:$0xff] %v207_v3  ;;  %v213_v6 = vld [vmem:[%s3298_s7 + $0x30] sm:$0xff] }
  0x14   : > { %210 = vst [vmem:[%s3303_s8 + $0x20] sm:$0xff] %v209_v4  ;;  %212 = vst [vmem:[%s3303_s8 + $0x28] sm:$0xff] %v211_v5  ;;  %v215_v7 = vld [vmem:[%s3298_s7 + $0x38] sm:$0xff]  ;;  %v217_v8 = vld [vmem:[%s3298_s7 + $0x40] sm:$0xff] }
  0x15   : > { %214 = vst [vmem:[%s3303_s8 + $0x30] sm:$0xff] %v213_v6  ;;  %216 = vst [vmem:[%s3303_s8 + $0x38] sm:$0xff] %v215_v7  ;;  %v219_v9 = vld [vmem:[%s3298_s7 + $0x48] sm:$0xff]  ;;  %v221_v10 = vld [vmem:[%s3298_s7 + $0x50] sm:$0xff] }
  0x16   : > { %218 = vst [vmem:[%s3303_s8 + $0x40] sm:$0xff] %v217_v8  ;;  %v223_v11 = vld [vmem:[%s3298_s7 + $0x58] sm:$0xff]  ;;  %220 = vst [vmem:[%s3303_s8 + $0x48] sm:$0xff] %v219_v9  ;;  %v225_v12 = vld [vmem:[%s3298_s7 + $0x60] sm:$0xff] }
  0x17   : > { %222 = vst [vmem:[%s3303_s8 + $0x50] sm:$0xff] %v221_v10  ;;  %224 = vst [vmem:[%s3303_s8 + $0x58] sm:$0xff] %v223_v11  ;;  %v227_v13 = vld [vmem:[%s3298_s7 + $0x68] sm:$0xff]  ;;  %v229_v14 = vld [vmem:[%s3298_s7 + $0x70] sm:$0xff] }
  0x18   : > { %226 = vst [vmem:[%s3303_s8 + $0x60] sm:$0xff] %v225_v12  ;;  %228 = vst [vmem:[%s3303_s8 + $0x68] sm:$0xff] %v227_v13  ;;  %v231_v15 = vld [vmem:[%s3298_s7 + $0x78] sm:$0xff]  ;;  %v233_v16 = vld [vmem:[%s3298_s7 + $0x100] sm:$0xff] }
  0x19   : > { %230 = vst [vmem:[%s3303_s8 + $0x70] sm:$0xff] %v229_v14  ;;  %v235_v17 = vld [vmem:[%s3298_s7 + $0x108] sm:$0xff]  ;;  %232 = vst [vmem:[%s3303_s8 + $0x78] sm:$0xff] %v231_v15  ;;  %v237_v18 = vld [vmem:[%s3298_s7 + $0x110] sm:$0xff] }
  0x1a   : > { %234 = vst [vmem:[%s3303_s8 + $0x80] sm:$0xff] %v233_v16  ;;  %236 = vst [vmem:[%s3303_s8 + $0x88] sm:$0xff] %v235_v17  ;;  %v239_v19 = vld [vmem:[%s3298_s7 + $0x118] sm:$0xff]  ;;  %v241_v20 = vld [vmem:[%s3298_s7 + $0x120] sm:$0xff] }
  0x1b   : > { %238 = vst [vmem:[%s3303_s8 + $0x90] sm:$0xff] %v237_v18  ;;  %240 = vst [vmem:[%s3303_s8 + $0x98] sm:$0xff] %v239_v19  ;;  %v243_v21 = vld [vmem:[%s3298_s7 + $0x128] sm:$0xff]  ;;  %v245_v22 = vld [vmem:[%s3298_s7 + $0x130] sm:$0xff] }
  0x1c   : > { %242 = vst [vmem:[%s3303_s8 + $0xa0] sm:$0xff] %v241_v20  ;;  %v247_v23 = vld [vmem:[%s3298_s7 + $0x138] sm:$0xff]  ;;  %244 = vst [vmem:[%s3303_s8 + $0xa8] sm:$0xff] %v243_v21  ;;  %v249_v24 = vld [vmem:[%s3298_s7 + $0x140] sm:$0xff] }
  0x1d   : > { %246 = vst [vmem:[%s3303_s8 + $0xb0] sm:$0xff] %v245_v22  ;;  %248 = vst [vmem:[%s3303_s8 + $0xb8] sm:$0xff] %v247_v23  ;;  %v251_v25 = vld [vmem:[%s3298_s7 + $0x148] sm:$0xff]  ;;  %v253_v26 = vld [vmem:[%s3298_s7 + $0x150] sm:$0xff] }
  0x1e   : > { %250 = vst [vmem:[%s3303_s8 + $0xc0] sm:$0xff] %v249_v24  ;;  %252 = vst [vmem:[%s3303_s8 + $0xc8] sm:$0xff] %v251_v25  ;;  %v255_v27 = vld [vmem:[%s3298_s7 + $0x158] sm:$0xff]  ;;  %v257_v28 = vld [vmem:[%s3298_s7 + $0x160] sm:$0xff] }
  0x1f   : > { %254 = vst [vmem:[%s3303_s8 + $0xd0] sm:$0xff] %v253_v26  ;;  %v259_v29 = vld [vmem:[%s3298_s7 + $0x168] sm:$0xff]  ;;  %256 = vst [vmem:[%s3303_s8 + $0xd8] sm:$0xff] %v255_v27  ;;  %v261_v30 = vld [vmem:[%s3298_s7 + $0x170] sm:$0xff] }
  0x20   : > { %258 = vst [vmem:[%s3303_s8 + $0xe0] sm:$0xff] %v257_v28  ;;  %260 = vst [vmem:[%s3303_s8 + $0xe8] sm:$0xff] %v259_v29  ;;  %v263_v31 = vld [vmem:[%s3298_s7 + $0x178] sm:$0xff] }
  0x21   : > { %262 = vst [vmem:[%s3303_s8 + $0xf0] sm:$0xff] %v261_v30  ;;  %264 = vst [vmem:[%s3303_s8 + $0xf8] sm:$0xff] %v263_v31 }
  0x22 PF: > { %p3067_p5 = scmp.ge.s32.totalorder %s3227_s22, 1  ;;  %p269_p6 = scmp.lt.s32.totalorder %s3227_s22, 3 }
  0x24   : > { %p270_p7 = pnand %p3067_p5, %p269_p6 }
  0x26   : > { %273 = sbr.rel (%p270_p7) target bundleno = 583 (0x247), region = 59 }
  0x2b   : > { %s276_s9 = sand.u32 1, %s3219_s20   ;;  %v3229_v32 = vmov 0   ;;  %v3386_v46 = vld [vmem:[%s4918_s1] sm:$0xff]   ;;  %vm577_vm0 = vcmask 130048   ;;  %v351_v57 = vld [vmem:[%s4919_s2 + $0x10] sm:$0xff]  ;;  %v350_v58 = vld [vmem:[%s4919_s2 + $0x8] sm:$0xff] }
  0x2c   : > { %s3068_s10 = sshll.u32 %s276_s9, 8  ;;  %622 = vmatprep.mubr.bf16.mxu0 %v3229_v32  ;;  %695 = vmatprep.mubr.bf16.mxu1 %v3229_v32  ;;  %v349_v55 = vld [vmem:[%s4919_s2] sm:$0xff]  ;;  %v3422_v59 = vld [vmem:[%s4918_s1 + $0x8] sm:$0xff]   ;;  %v352_v60 = vld [vmem:[%s4919_s2 + $0x18] sm:$0xff]  ;;  %s3918_s12 = sshll.u32 %s3060_s4, 5 }
  0x2d   : > { %3199 = vset.pattern.permute.xlu0 %v3229_v32  ;;  %3200 = vset.pattern.permute.xlu1 %v3229_v32  ;;  %s3373_s11 = scalar_lea.vmem [#allocation3], %s3068_s10  ;;  %v2014_v61 = vld [vmem:[%s4920_s3] sm:$0xff]  ;;  %v2015_v62 = vld [vmem:[%s4920_s3 + $0x8] sm:$0xff]  ;;  %v3445_v0 = vld [vmem:[%s4918_s1 + $0x10] sm:$0xff]   ;;  %p304_p8 = scmp.lt.s32.totalorder %s3918_s12, 63 }
  0x2e   : > { %v317_v33 = vld [vmem:[%s3373_s11] sm:$0xff]  ;;  %v318_v35 = vld [vmem:[%s3373_s11 + $0x8] sm:$0xff]  ;;  %v319_v39 = vld [vmem:[%s3373_s11 + $0x10] sm:$0xff]  ;;  %359 = vperm.xlu0 %3199, %v349_v55   ;;  %369 = vperm.xlu1 %3200, %v351_v57  }
  0x2f   : > { %v333_v34 = vld [vmem:[%s3373_s11 + $0x80] sm:$0xff]  ;;  %v334_v37 = vld [vmem:[%s3373_s11 + $0x88] sm:$0xff]  ;;  %v335_v40 = vld [vmem:[%s3373_s11 + $0x90] sm:$0xff]  ;;  %s5040_s12 = smov (!%p304_p8, %s3918_s12), 63 }
  0x30   : > { %v3075_v36 = vcombine.high %v317_v33, %v333_v34  ;;  %v3074_v38 = vcombine.low %v317_v33, %v333_v34  ;;  %v3077_v41 = vcombine.high %v318_v35, %v334_v37  ;;  %v3076_v42 = vcombine.low %v318_v35, %v334_v37  ;;  %v320_v44 = vld [vmem:[%s3373_s11 + $0x18] sm:$0xff]  ;;  %v3389_v49 = vld [vmem:[%s3373_s11 + $0x20] sm:$0xff]  ;;  %v3395_v51 = vld [vmem:[%s3373_s11 + $0x28] sm:$0xff]  ;;  %s3983_s13 = scalar_lea.vmem %s4922_s5, %s5040_s12 }
  0x31   : > { %v3079_v43 = vcombine.high %v319_v39, %v335_v40  ;;  %v336_v45 = vld [vmem:[%s3373_s11 + $0x98] sm:$0xff]  ;;  %v3078_v48 = vcombine.low %v319_v39, %v335_v40  ;;  %v3392_v50 = vld [vmem:[%s3373_s11 + $0xa0] sm:$0xff]  ;;  %v3398_v53 = vld [vmem:[%s3373_s11 + $0xa8] sm:$0xff] }
  0x32   : > { %604 = vmatprep.subr.bf16.mxu0 %v3075_v36  ;;  %v3081_v47 = vcombine.high %v320_v44, %v336_v45  ;;  %677 = vmatprep.subr.bf16.mxu1 %v3077_v41  ;;  %v3080_v52 = vcombine.low %v320_v44, %v336_v45  ;;  %v3083_v54 = vcombine.high %v3389_v49, %v3392_v50  ;;  %v353_v63 = vld [vmem:[%s4919_s2 + $0x20] sm:$0xff]  ;;  %v2016_v1 = vld [vmem:[%s4920_s3 + $0x10] sm:$0xff]  ;;  %v354_v2 = vld [vmem:[%s4919_s2 + $0x28] sm:$0xff] }
  0x33   : > { %605 = vmatpush1.bf16.msra.mxu0 %v3074_v38  ;;  %678 = vmatpush1.bf16.msra.mxu1 %v3076_v42  ;;  %v3085_v56 = vcombine.high %v3395_v51, %v3398_v53  ;;  %v2017_v3 = vld [vmem:[%s4920_s3 + $0x18] sm:$0xff]  ;;  %v355_v4 = vld [vmem:[%s4919_s2 + $0x30] sm:$0xff]  ;;  %v2018_v6 = vld [vmem:[%s4920_s3 + $0x20] sm:$0xff]  ;;  %v3082_v12 = vcombine.low %v3389_v49, %v3392_v50  ;;  %v3084_v16 = vcombine.low %v3395_v51, %v3398_v53 }
  0x34   : > { %750 = vmatprep.subr.bf16.mxu0 %v3079_v43  ;;  %823 = vmatprep.subr.bf16.mxu1 %v3081_v47  ;;  %v3468_v5 = vld [vmem:[%s4918_s1 + $0x18] sm:$0xff]   ;;  %v2019_v8 = vld [vmem:[%s4920_s3 + $0x28] sm:$0xff]  ;;  %v2020_v9 = vld [vmem:[%s4920_s3 + $0x30] sm:$0xff] }
  0x35   : > { %364 = vperm.xlu0 %3199, %v350_v58   ;;  %374 = vperm.xlu1 %3200, %v352_v60   ;;  %v356_v7 = vld [vmem:[%s4919_s2 + $0x38] sm:$0xff]  ;;  %v323_v10 = vld [vmem:[%s3373_s11 + $0x30] sm:$0xff]  ;;  %v325_v19 = vld [vmem:[%s3373_s11 + $0x40] sm:$0xff] }
  0x36   : > { %3106 = vmatmul.mubr.msk.bf16.vlgmr.msra.gmra.mxu0 %vm577_vm0, %v3386_v46  ;;  %3110 = vmatmul.mubr.msk.bf16.vlgmr.msra.gmra.mxu1 %vm577_vm0, %v3386_v46  ;;  %v339_v11 = vld [vmem:[%s3373_s11 + $0xb0] sm:$0xff]  ;;  %v324_v13 = vld [vmem:[%s3373_s11 + $0x38] sm:$0xff]  ;;  %v341_v20 = vld [vmem:[%s3373_s11 + $0xc0] sm:$0xff] }
  0x37   : > { %751 = vmatpush1.bf16.msra.mxu0 %v3078_v48  ;;  %824 = vmatpush1.bf16.msra.mxu1 %v3080_v52  ;;  %v340_v14 = vld [vmem:[%s3373_s11 + $0xb8] sm:$0xff]  ;;  %v3087_v17 = vcombine.high %v323_v10, %v339_v11  ;;  %v3086_v21 = vcombine.low %v323_v10, %v339_v11  ;;  %v326_v22 = vld [vmem:[%s3373_s11 + $0x48] sm:$0xff]  ;;  %v3091_v25 = vcombine.high %v325_v19, %v341_v20  ;;  %v327_v27 = vld [vmem:[%s3373_s11 + $0x50] sm:$0xff] }
  0x38   : > { %632 = vmatprep.mubr.bf16.mxu0 %v3229_v32  ;;  %705 = vmatprep.mubr.bf16.mxu1 %v3229_v32  ;;  %v2021_v15 = vld [vmem:[%s4920_s3 + $0x38] sm:$0xff]  ;;  %v3089_v18 = vcombine.high %v324_v13, %v340_v14  ;;  %v342_v23 = vld [vmem:[%s3373_s11 + $0xc8] sm:$0xff]  ;;  %v3088_v24 = vcombine.low %v324_v13, %v340_v14  ;;  %v343_v28 = vld [vmem:[%s3373_s11 + $0xd0] sm:$0xff]  ;;  %v3090_v29 = vcombine.low %v325_v19, %v341_v20 }
  0x39   : > { %896 = vmatprep.subr.bf16.mxu0 %v3083_v54  ;;  %969 = vmatprep.subr.bf16.mxu1 %v3085_v56  ;;  %v3093_v26 = vcombine.high %v326_v22, %v342_v23  ;;  %v328_v30 = vld [vmem:[%s3373_s11 + $0x58] sm:$0xff]  ;;  %v3092_v33 = vcombine.low %v326_v22, %v342_v23  ;;  %v3095_v34 = vcombine.high %v327_v27, %v343_v28  ;;  %v329_v36 = vld [vmem:[%s3373_s11 + $0x60] sm:$0xff]  ;;  %v330_v39 = vld [vmem:[%s3373_s11 + $0x68] sm:$0xff] }
  0x3a   : > { %2024 = vperm.xlu0 %3199, %v2014_v61   ;;  %2029 = vperm.xlu1 %3200, %v2015_v62   ;;  %v344_v31 = vld [vmem:[%s3373_s11 + $0xd8] sm:$0xff]  ;;  %v345_v37 = vld [vmem:[%s3373_s11 + $0xe0] sm:$0xff]  ;;  %v3094_v38 = vcombine.low %v327_v27, %v343_v28  ;;  %v346_v40 = vld [vmem:[%s3373_s11 + $0xe8] sm:$0xff]  ;;  %v3230_v62 = vmov 1966171168  }
  0x3b   : > { %v3097_v35 = vcombine.high %v328_v30, %v344_v31  ;;  %v3096_v41 = vcombine.low %v328_v30, %v344_v31  ;;  %v3099_v42 = vcombine.high %v329_v36, %v345_v37  ;;  %v3101_v43 = vcombine.high %v330_v39, %v346_v40  ;;  %v331_v44 = vld [vmem:[%s3373_s11 + $0x70] sm:$0xff]  ;;  %v332_v48 = vld [vmem:[%s3373_s11 + $0x78] sm:$0xff] }
  0x3c   : > { %v347_v45 = vld [vmem:[%s3373_s11 + $0xf0] sm:$0xff]  ;;  %v3098_v47 = vcombine.low %v329_v36, %v345_v37  ;;  %v348_v49 = vld [vmem:[%s3373_s11 + $0xf8] sm:$0xff]  ;;  %v3100_v50 = vcombine.low %v330_v39, %v346_v40  ;;  %s3647_s11 = sld [smem:[#allocation2]] }
  0x3d   : > { %v3103_v51 = vcombine.high %v331_v44, %v347_v45  ;;  %v3105_v52 = vcombine.high %v332_v48, %v348_v49  ;;  %v3102_v57 = vcombine.low %v331_v44, %v347_v45  ;;  %v3104_v58 = vcombine.low %v332_v48, %v348_v49 }
  0x3e   : > { %3107 = vmatmul.mubr.msk.bf16.gmra.mxu0 %vm577_vm0, %v3422_v59  ;;  %3111 = vmatmul.mubr.msk.bf16.gmra.mxu1 %vm577_vm0, %v3422_v59 }
  0x3f   : > { %642 = vmatprep.mubr.bf16.mxu0 %v3229_v32  ;;  %715 = vmatprep.mubr.bf16.mxu1 %v3229_v32 }
  0x40   : > { %379 = vperm.xlu0 %3199, %v353_v63   ;;  %2034 = vperm.xlu1 %3200, %v2016_v1   ;;  %v2805_v63 = vunpack.c.l.s4 %v3230_v62  ;;  %v2807_v1 = vlaneseq }
  0x42   : > { %v2806_v11 = vunpack.c.0.s8 %v2805_v63  ;;  %v3667_v27 = vstv %s3647_s11 }
  0x44   : > { %384 = vperm.xlu0 %3199, %v354_v2   ;;  %2039 = vperm.xlu1 %3200, %v2017_v3  }
  0x46   : > { %3108 = vmatmul.mubr.msk.bf16.gmra.mxu0 %vm577_vm0, %v3445_v0  ;;  %3112 = vmatmul.mubr.msk.bf16.gmra.mxu1 %vm577_vm0, %v3445_v0 }
  0x47   : > { %652 = vmatprep.mubr.bf16.mxu0 %v3229_v32  ;;  %725 = vmatprep.mubr.bf16.mxu1 %v3229_v32 }
  0x48   : > { %389 = vperm.xlu0 %3199, %v355_v4   ;;  %2044 = vperm.xlu1 %3200, %v2018_v6  }
  0x4c   : > { %394 = vperm.xlu0 %3199, %v356_v7   ;;  %2049 = vperm.xlu1 %3200, %v2019_v8  }
  0x4e   : > { %3109 = vmatmul.mubr.msk.bf16.gmra.mxu0 %vm577_vm0, %v3468_v5  ;;  %3113 = vmatmul.mubr.msk.bf16.gmra.mxu1 %vm577_vm0, %v3468_v5 }
  0x4f   : > { %768 = vmatprep.mubr.bf16.mxu0 %v3229_v32  ;;  %841 = vmatprep.mubr.bf16.mxu1 %v3229_v32 }
  0x50   : > { %2054 = vperm.xlu0 %3199, %v2020_v9   ;;  %2059 = vperm.xlu1 %3200, %v2021_v15  }
  0x56   : > { %3114 = vmatmul.mubr.msk.bf16.vlgmr.msra.gmra.mxu0 %vm577_vm0, %v3386_v46  ;;  %3118 = vmatmul.mubr.msk.bf16.vlgmr.msra.gmra.mxu1 %vm577_vm0, %v3386_v46 }
  0x57   : > { %897 = vmatpush1.bf16.msra.mxu0 %v3082_v12  ;;  %970 = vmatpush1.bf16.msra.mxu1 %v3084_v16  ;;  %v2808_v12 = vshrl.u32 %v2807_v1, 7 }
  0x58   : > { %778 = vmatprep.mubr.bf16.mxu0 %v3229_v32  ;;  %851 = vmatprep.mubr.bf16.mxu1 %v3229_v32 }
  0x59   : > { %1042 = vmatprep.subr.bf16.mxu0 %v3087_v17  ;;  %1115 = vmatprep.subr.bf16.mxu1 %v3089_v18  ;;  %v3669_v28 = vsub.s32 %v2806_v11, %v2808_v12 }
  0x5e   : > { %3115 = vmatmul.mubr.msk.bf16.gmra.mxu0 %vm577_vm0, %v3422_v59  ;;  %3119 = vmatmul.mubr.msk.bf16.gmra.mxu1 %vm577_vm0, %v3422_v59 }
  0x5f   : > { %788 = vmatprep.mubr.bf16.mxu0 %v3229_v32  ;;  %861 = vmatprep.mubr.bf16.mxu1 %v3229_v32 }
  0x66   : > { %3116 = vmatmul.mubr.msk.bf16.gmra.mxu0 %vm577_vm0, %v3445_v0  ;;  %3120 = vmatmul.mubr.msk.bf16.gmra.mxu1 %vm577_vm0, %v3445_v0 }
  0x67   : > { %798 = vmatprep.mubr.bf16.mxu0 %v3229_v32  ;;  %871 = vmatprep.mubr.bf16.mxu1 %v3229_v32 }
  0x6e   : > { %3117 = vmatmul.mubr.msk.bf16.gmra.mxu0 %vm577_vm0, %v3468_v5  ;;  %3121 = vmatmul.mubr.msk.bf16.gmra.mxu1 %vm577_vm0, %v3468_v5 }
  0x6f   : > { %914 = vmatprep.mubr.bf16.mxu0 %v3229_v32  ;;  %987 = vmatprep.mubr.bf16.mxu1 %v3229_v32 }
  0x76   : > { %3122 = vmatmul.mubr.msk.bf16.vlgmr.msra.gmra.mxu0 %vm577_vm0, %v3386_v46  ;;  %3126 = vmatmul.mubr.msk.bf16.vlgmr.msra.gmra.mxu1 %vm577_vm0, %v3386_v46 }
  0x77   : > { %1043 = vmatpush1.bf16.msra.mxu0 %v3086_v21  ;;  %1116 = vmatpush1.bf16.msra.mxu1 %v3088_v24 }
  0x78   : > { %924 = vmatprep.mubr.bf16.mxu0 %v3229_v32  ;;  %997 = vmatprep.mubr.bf16.mxu1 %v3229_v32 }
  0x79   : > { %1188 = vmatprep.subr.bf16.mxu0 %v3091_v25  ;;  %1261 = vmatprep.subr.bf16.mxu1 %v3093_v26 }
  0x7e   : > { %3123 = vmatmul.mubr.msk.bf16.gmra.mxu0 %vm577_vm0, %v3422_v59  ;;  %3127 = vmatmul.mubr.msk.bf16.gmra.mxu1 %vm577_vm0, %v3422_v59 }
  0x7f   : > { %934 = vmatprep.mubr.bf16.mxu0 %v3229_v32  ;;  %1007 = vmatprep.mubr.bf16.mxu1 %v3229_v32 }
  0x86   : > { %3124 = vmatmul.mubr.msk.bf16.gmra.mxu0 %vm577_vm0, %v3445_v0  ;;  %3128 = vmatmul.mubr.msk.bf16.gmra.mxu1 %vm577_vm0, %v3445_v0 }
  0x87   : > { %944 = vmatprep.mubr.bf16.mxu0 %v3229_v32  ;;  %1017 = vmatprep.mubr.bf16.mxu1 %v3229_v32 }
  0x8e   : > { %3125 = vmatmul.mubr.msk.bf16.gmra.mxu0 %vm577_vm0, %v3468_v5  ;;  %3129 = vmatmul.mubr.msk.bf16.gmra.mxu1 %vm577_vm0, %v3468_v5 }
  0x8f   : > { %1060 = vmatprep.mubr.bf16.mxu0 %v3229_v32  ;;  %1133 = vmatprep.mubr.bf16.mxu1 %v3229_v32 }
  0x96   : > { %3130 = vmatmul.mubr.msk.bf16.vlgmr.msra.gmra.mxu0 %vm577_vm0, %v3386_v46  ;;  %3134 = vmatmul.mubr.msk.bf16.vlgmr.msra.gmra.mxu1 %vm577_vm0, %v3386_v46 }
  0x97   : > { %1189 = vmatpush1.bf16.msra.mxu0 %v3090_v29  ;;  %1262 = vmatpush1.bf16.msra.mxu1 %v3092_v33 }
  0x98   : > { %1070 = vmatprep.mubr.bf16.mxu0 %v3229_v32  ;;  %1143 = vmatprep.mubr.bf16.mxu1 %v3229_v32 }
  0x99   : > { %1334 = vmatprep.subr.bf16.mxu0 %v3095_v34  ;;  %1407 = vmatprep.subr.bf16.mxu1 %v3097_v35 }
  0x9e   : > { %3131 = vmatmul.mubr.msk.bf16.gmra.mxu0 %vm577_vm0, %v3422_v59  ;;  %3135 = vmatmul.mubr.msk.bf16.gmra.mxu1 %vm577_vm0, %v3422_v59 }
  0x9f   : > { %1080 = vmatprep.mubr.bf16.mxu0 %v3229_v32  ;;  %1153 = vmatprep.mubr.bf16.mxu1 %v3229_v32 }
  0xa6   : > { %3132 = vmatmul.mubr.msk.bf16.gmra.mxu0 %vm577_vm0, %v3445_v0  ;;  %3136 = vmatmul.mubr.msk.bf16.gmra.mxu1 %vm577_vm0, %v3445_v0 }
  0xa7   : > { %1090 = vmatprep.mubr.bf16.mxu0 %v3229_v32  ;;  %1163 = vmatprep.mubr.bf16.mxu1 %v3229_v32 }
  0xa9   : > { %v3629_v53 = vpop.permute.xlu0 %359  ;;  %v3631_v54 = vpop.permute.xlu1 %369 }
  0xaa   : > { %4949 = vst [vmem:[#allocation4_spill] sm:$0xff] %v3629_v53  ;;  %4950 = vst [vmem:[#allocation5_spill] sm:$0xff] %v3631_v54 }
  0xae   : > { %3133 = vmatmul.mubr.msk.bf16.gmra.mxu0 %vm577_vm0, %v3468_v5  ;;  %3137 = vmatmul.mubr.msk.bf16.gmra.mxu1 %vm577_vm0, %v3468_v5 }
  0xaf   : > { %1206 = vmatprep.mubr.bf16.mxu0 %v3229_v32  ;;  %1279 = vmatprep.mubr.bf16.mxu1 %v3229_v32 }
  0xb0   : > { %v3635_v55 = vpop.permute.xlu0 %364  ;;  %v3637_v56 = vpop.permute.xlu1 %374 }
  0xb1   : > { %4951 = vst [vmem:[#allocation6_spill] sm:$0xff] %v3635_v55 }
  0xb5   : > { %v3643_v60 = vpop.permute.xlu0 %2024  ;;  %v3645_v61 = vpop.permute.xlu1 %2029 }
  0xb6   : > { %3138 = vmatmul.mubr.msk.bf16.vlgmr.msra.gmra.mxu0 %vm577_vm0, %v3386_v46  ;;  %3142 = vmatmul.mubr.msk.bf16.vlgmr.msra.gmra.mxu1 %vm577_vm0, %v3386_v46  ;;  %4952 = vst [vmem:[#allocation7_spill] sm:$0xff] %v3643_v60  ;;  %4953 = vst [vmem:[#allocation8_spill] sm:$0xff] %v3645_v61 }
  0xb7   : > { %1335 = vmatpush1.bf16.msra.mxu0 %v3094_v38  ;;  %1408 = vmatpush1.bf16.msra.mxu1 %v3096_v41 }
  0xb8   : > { %1216 = vmatprep.mubr.bf16.mxu0 %v3229_v32  ;;  %1289 = vmatprep.mubr.bf16.mxu1 %v3229_v32 }
  0xb9   : > { %1480 = vmatprep.subr.bf16.mxu0 %v3099_v42  ;;  %1553 = vmatprep.subr.bf16.mxu1 %v3101_v43 }
  0xbb   : > { %v3656_v8 = vpop.permute.xlu0 %379  ;;  %v3661_v17 = vpop.permute.xlu1 %2034 }
  0xbe   : > { %3139 = vmatmul.mubr.msk.bf16.gmra.mxu0 %vm577_vm0, %v3422_v59  ;;  %3143 = vmatmul.mubr.msk.bf16.gmra.mxu1 %vm577_vm0, %v3422_v59 }
  0xbf   : > { %1226 = vmatprep.mubr.bf16.mxu0 %v3229_v32  ;;  %1299 = vmatprep.mubr.bf16.mxu1 %v3229_v32  ;;  %v3674_v33 = vpop.permute.xlu0 %384  ;;  %v3686_v44 = vpop.permute.xlu1 %2039 }
  0xc3   : > { %v3697_v12 = vpop.permute.xlu0 %389 }
  0xc6   : > { %3140 = vmatmul.mubr.msk.bf16.gmra.mxu0 %vm577_vm0, %v3445_v0  ;;  %3144 = vmatmul.mubr.msk.bf16.gmra.mxu1 %vm577_vm0, %v3445_v0 }
  0xc7   : > { %1236 = vmatprep.mubr.bf16.mxu0 %v3229_v32  ;;  %1309 = vmatprep.mubr.bf16.mxu1 %v3229_v32 }
  0xce   : > { %3141 = vmatmul.mubr.msk.bf16.gmra.mxu0 %vm577_vm0, %v3468_v5  ;;  %3145 = vmatmul.mubr.msk.bf16.gmra.mxu1 %vm577_vm0, %v3468_v5 }
  0xcf   : > { %1352 = vmatprep.mubr.bf16.mxu0 %v3229_v32  ;;  %1425 = vmatprep.mubr.bf16.mxu1 %v3229_v32 }
  0xd6   : > { %3146 = vmatmul.mubr.msk.bf16.vlgmr.msra.gmra.mxu0 %vm577_vm0, %v3386_v46  ;;  %3150 = vmatmul.mubr.msk.bf16.vlgmr.msra.gmra.mxu1 %vm577_vm0, %v3386_v46 }
  0xd7   : > { %1481 = vmatpush1.bf16.msra.mxu0 %v3098_v47  ;;  %1554 = vmatpush1.bf16.msra.mxu1 %v3100_v50 }
  0xd8   : > { %1362 = vmatprep.mubr.bf16.mxu0 %v3229_v32  ;;  %1435 = vmatprep.mubr.bf16.mxu1 %v3229_v32 }
  0xd9   : > { %1626 = vmatprep.subr.bf16.mxu0 %v3103_v51  ;;  %1699 = vmatprep.subr.bf16.mxu1 %v3105_v52 }
  0xde   : > { %3147 = vmatmul.mubr.msk.bf16.gmra.mxu0 %vm577_vm0, %v3422_v59  ;;  %3151 = vmatmul.mubr.msk.bf16.gmra.mxu1 %vm577_vm0, %v3422_v59 }
  0xdf   : > { %1372 = vmatprep.mubr.bf16.mxu0 %v3229_v32  ;;  %1445 = vmatprep.mubr.bf16.mxu1 %v3229_v32 }
  0xe6   : > { %3148 = vmatmul.mubr.msk.bf16.gmra.mxu0 %vm577_vm0, %v3445_v0  ;;  %3152 = vmatmul.mubr.msk.bf16.gmra.mxu1 %vm577_vm0, %v3445_v0 }
  0xe7   : > { %1382 = vmatprep.mubr.bf16.mxu0 %v3229_v32  ;;  %1455 = vmatprep.mubr.bf16.mxu1 %v3229_v32 }
  0xee   : > { %3149 = vmatmul.mubr.msk.bf16.gmra.mxu0 %vm577_vm0, %v3468_v5  ;;  %3153 = vmatmul.mubr.msk.bf16.gmra.mxu1 %vm577_vm0, %v3468_v5 }
  0xef   : > { %1498 = vmatprep.mubr.bf16.mxu0 %v3229_v32  ;;  %1571 = vmatprep.mubr.bf16.mxu1 %v3229_v32 }
  0xf6   : > { %v624_v2 = vpop.f32.mrf.mxu0  ;;  %3154 = vmatmul.mubr.msk.bf16.vlgmr.msra.gmra.mxu0 %vm577_vm0, %v3386_v46  ;;  %v697_v4 = vpop.f32.mrf.mxu1  ;;  %3158 = vmatmul.mubr.msk.bf16.vlgmr.msra.gmra.mxu1 %vm577_vm0, %v3386_v46 }
  0xf7   : > { %v625_v3 = vadd.f32 %v624_v2, %v3629_v53  ;;  %1627 = vmatpush1.bf16.msra.mxu0 %v3102_v57  ;;  %v698_v6 = vadd.f32 %v697_v4, %v3629_v53  ;;  %1700 = vmatpush1.bf16.msra.mxu1 %v3104_v58 }
  0xf8   : > { %v626_v7 = vpop.f32.mrf.mxu0  ;;  %1508 = vmatprep.mubr.bf16.mxu0 %v3229_v32  ;;  %v699_v10 = vpop.f32.mrf.mxu1  ;;  %1581 = vmatprep.mubr.bf16.mxu1 %v3229_v32 }
  0xf9   : > { %v627_v9 = vadd.f32 %v626_v7, %v3629_v53  ;;  %v1758_v13 = vmax.f32 %v625_v3, 0.0  ;;  %v1760_v14 = vmax.f32 %v698_v6, 0.0  ;;  %v700_v15 = vadd.f32 %v699_v10, %v3629_v53 }
  0xfa   : > { %v628_v16 = vpop.f32.mrf.mxu0  ;;  %v701_v20 = vpop.f32.mrf.mxu1 }
  0xfb   : > { %v1759_v18 = vmax.f32 %v627_v9, 0.0  ;;  %v629_v19 = vadd.f32 %v628_v16, %v3635_v55  ;;  %v1761_v21 = vmax.f32 %v700_v15, 0.0  ;;  %v702_v22 = vadd.f32 %v701_v20, %v3635_v55 }
  0xfc   : > { %v630_v23 = vpop.f32.mrf.mxu0  ;;  %v703_v26 = vpop.f32.mrf.mxu1  ;;  %v2062_v34 = vmul.f32 %v3643_v60, %v1758_v13  ;;  %v2064_v35 = vmul.f32 %v3643_v60, %v1760_v14 }
  0xfd   : > { %v1790_v24 = vmax.f32 %v629_v19, 0.0  ;;  %v631_v25 = vadd.f32 %v630_v23, %v3635_v55  ;;  %v1792_v29 = vmax.f32 %v702_v22, 0.0  ;;  %v704_v30 = vadd.f32 %v703_v26, %v3635_v55 }
  0xfe   : > { %v634_v31 = vpop.f32.mrf.mxu0  ;;  %3155 = vmatmul.mubr.msk.bf16.gmra.mxu0 %vm577_vm0, %v3422_v59  ;;  %v707_v38 = vpop.f32.mrf.mxu1  ;;  %3159 = vmatmul.mubr.msk.bf16.gmra.mxu1 %vm577_vm0, %v3422_v59  ;;  %v2063_v39 = vmul.f32 %v3643_v60, %v1759_v18  ;;  %v2065_v45 = vmul.f32 %v3643_v60, %v1761_v21 }
  0xff   : > { %v1791_v36 = vmax.f32 %v631_v25, 0.0  ;;  %v635_v37 = vadd.f32 %v634_v31, %v3631_v54  ;;  %1518 = vmatprep.mubr.bf16.mxu0 %v3229_v32  ;;  %v2094_v40 = vmul.f32 %v3645_v61, %v1790_v24  ;;  %v1793_v41 = vmax.f32 %v704_v30, 0.0  ;;  %1591 = vmatprep.mubr.bf16.mxu1 %v3229_v32  ;;  %v3705_v24 = vpop.permute.xlu1 %2044 }
 0x100   : > { %v708_v42 = vadd.f32 %v707_v38, %v3631_v54  ;;  %v636_v43 = vpop.f32.mrf.mxu0  ;;  %v2096_v47 = vmul.f32 %v3645_v61, %v1792_v29  ;;  %v709_v50 = vpop.f32.mrf.mxu1 }
 0x101   : > { %v1822_v48 = vmax.f32 %v635_v37, 0.0  ;;  %v637_v49 = vadd.f32 %v636_v43, %v3631_v54  ;;  %v2095_v51 = vmul.f32 %v3645_v61, %v1791_v36  ;;  %v2318_v52 = vadd.f32 %v2094_v40, %v2062_v34 }
 0x102   : > { %v1824_v57 = vmax.f32 %v708_v42, 0.0  ;;  %v710_v58 = vadd.f32 %v709_v50, %v3631_v54  ;;  %v638_v62 = vpop.f32.mrf.mxu0  ;;  %v2097_v63 = vmul.f32 %v3645_v61, %v1793_v41  ;;  %v2344_v1 = vadd.f32 %v2096_v47, %v2064_v35  ;;  %v711_v4 = vpop.f32.mrf.mxu1 }
 0x103   : > { %v1823_v2 = vmax.f32 %v637_v49, 0.0  ;;  %v639_v3 = vadd.f32 %v638_v62, %v3637_v56  ;;  %v2126_v6 = vmul.f32 %v3661_v17, %v1822_v48  ;;  %v2331_v7 = vadd.f32 %v2095_v51, %v2063_v39  ;;  %v3719_v51 = vpop.permute.xlu0 %394 }
 0x104   : > { %v1825_v9 = vmax.f32 %v710_v58, 0.0  ;;  %v712_v10 = vadd.f32 %v711_v4, %v3637_v56  ;;  %v640_v11 = vpop.f32.mrf.mxu0  ;;  %v2128_v13 = vmul.f32 %v3661_v17, %v1824_v57  ;;  %v2357_v14 = vadd.f32 %v2097_v63, %v2065_v45  ;;  %v713_v18 = vpop.f32.mrf.mxu1 }
 0x105   : > { %v1854_v15 = vmax.f32 %v639_v3, 0.0  ;;  %v641_v16 = vadd.f32 %v640_v11, %v3637_v56  ;;  %v2127_v19 = vmul.f32 %v3661_v17, %v1823_v2  ;;  %v2319_v20 = vadd.f32 %v2318_v52, %v2126_v6 }
 0x106   : > { %v1856_v21 = vmax.f32 %v712_v10, 0.0  ;;  %v714_v22 = vadd.f32 %v713_v18, %v3637_v56  ;;  %v644_v23 = vpop.f32.mrf.mxu0  ;;  %3156 = vmatmul.mubr.msk.bf16.gmra.mxu0 %vm577_vm0, %v3445_v0  ;;  %v2129_v25 = vmul.f32 %v3661_v17, %v1825_v9  ;;  %v2345_v26 = vadd.f32 %v2344_v1, %v2128_v13  ;;  %v717_v31 = vpop.f32.mrf.mxu1  ;;  %3160 = vmatmul.mubr.msk.bf16.gmra.mxu1 %vm577_vm0, %v3445_v0 }
 0x107   : > { %v1855_v29 = vmax.f32 %v641_v16, 0.0  ;;  %v645_v30 = vadd.f32 %v644_v23, %v3656_v8  ;;  %1528 = vmatprep.mubr.bf16.mxu0 %v3229_v32  ;;  %v2158_v34 = vmul.f32 %v3686_v44, %v1854_v15  ;;  %v2332_v35 = vadd.f32 %v2331_v7, %v2127_v19  ;;  %1601 = vmatprep.mubr.bf16.mxu1 %v3229_v32  ;;  %v3725_v7 = vpop.permute.xlu1 %2049 }
 0x108   : > { %v1857_v36 = vmax.f32 %v714_v22, 0.0  ;;  %v718_v37 = vadd.f32 %v717_v31, %v3656_v8  ;;  %v646_v38 = vpop.f32.mrf.mxu0  ;;  %v2160_v39 = vmul.f32 %v3686_v44, %v1856_v21  ;;  %v2358_v40 = vadd.f32 %v2357_v14, %v2129_v25  ;;  %v719_v43 = vpop.f32.mrf.mxu1 }
 0x109   : > { %v1886_v41 = vmax.f32 %v645_v30, 0.0  ;;  %v647_v42 = vadd.f32 %v646_v38, %v3656_v8  ;;  %v2159_v45 = vmul.f32 %v3686_v44, %v1855_v29  ;;  %v2320_v47 = vadd.f32 %v2319_v20, %v2158_v34 }
 0x10a   : > { %v1888_v48 = vmax.f32 %v718_v37, 0.0  ;;  %v720_v49 = vadd.f32 %v719_v43, %v3656_v8  ;;  %v648_v50 = vpop.f32.mrf.mxu0  ;;  %v2161_v52 = vmul.f32 %v3686_v44, %v1857_v36  ;;  %v2346_v57 = vadd.f32 %v2345_v26, %v2160_v39  ;;  %v721_v63 = vpop.f32.mrf.mxu1 }
 0x10b   : > { %v1887_v58 = vmax.f32 %v647_v42, 0.0  ;;  %v649_v62 = vadd.f32 %v648_v50, %v3674_v33  ;;  %v2190_v1 = vmul.f32 %v3705_v24, %v1886_v41  ;;  %v2333_v2 = vadd.f32 %v2332_v35, %v2159_v45  ;;  %v3740_v36 = vpop.permute.xlu0 %2054 }
 0x10c   : > { %v1889_v3 = vmax.f32 %v720_v49, 0.0  ;;  %v722_v4 = vadd.f32 %v721_v63, %v3674_v33  ;;  %v650_v6 = vpop.f32.mrf.mxu0  ;;  %v2192_v9 = vmul.f32 %v3705_v24, %v1888_v48  ;;  %v2359_v10 = vadd.f32 %v2358_v40, %v2161_v52  ;;  %v723_v14 = vpop.f32.mrf.mxu1  ;;  %4954 = vst [vmem:[#allocation9_spill] sm:$0xff] %v3740_v36 }
 0x10d   : > { %v1918_v11 = vmax.f32 %v649_v62, 0.0  ;;  %v651_v13 = vadd.f32 %v650_v6, %v3674_v33  ;;  %v2191_v15 = vmul.f32 %v3705_v24, %v1887_v58  ;;  %v2321_v16 = vadd.f32 %v2320_v47, %v2190_v1 }
 0x10e   : > { %v1920_v18 = vmax.f32 %v722_v4, 0.0  ;;  %v724_v19 = vadd.f32 %v723_v14, %v3674_v33  ;;  %v654_v20 = vpop.f32.mrf.mxu0  ;;  %3157 = vmatmul.mubr.msk.bf16.gmra.mxu0 %vm577_vm0, %v3468_v5  ;;  %v2193_v21 = vmul.f32 %v3705_v24, %v1889_v3  ;;  %v2347_v22 = vadd.f32 %v2346_v57, %v2192_v9  ;;  %v727_v26 = vpop.f32.mrf.mxu1  ;;  %3161 = vmatmul.mubr.msk.bf16.gmra.mxu1 %vm577_vm0, %v3468_v5 }
 0x10f   : > { %v1919_v23 = vmax.f32 %v651_v13, 0.0  ;;  %v655_v25 = vadd.f32 %v654_v20, %v3697_v12  ;;  %1644 = vmatprep.mubr.bf16.mxu0 %v3229_v32  ;;  %v2222_v29 = vmul.f32 %v3725_v7, %v1918_v11  ;;  %v2334_v30 = vadd.f32 %v2333_v2, %v2191_v15  ;;  %1717 = vmatprep.mubr.bf16.mxu1 %v3229_v32  ;;  %v3751_v4 = vpop.permute.xlu1 %2059 }
 0x110   : > { %v1921_v31 = vmax.f32 %v724_v19, 0.0  ;;  %v728_v34 = vadd.f32 %v727_v26, %v3697_v12  ;;  %v656_v35 = vpop.f32.mrf.mxu0  ;;  %v2224_v37 = vmul.f32 %v3725_v7, %v1920_v18  ;;  %v2360_v38 = vadd.f32 %v2359_v10, %v2193_v21  ;;  %v729_v41 = vpop.f32.mrf.mxu1  ;;  %4955 = vst [vmem:[#allocation10_spill] sm:$0xff] %v3751_v4 }
 0x111   : > { %v1950_v39 = vmax.f32 %v655_v25, 0.0  ;;  %v657_v40 = vadd.f32 %v656_v35, %v3697_v12  ;;  %v2223_v42 = vmul.f32 %v3725_v7, %v1919_v23  ;;  %v2322_v43 = vadd.f32 %v2321_v16, %v2222_v29 }
 0x112   : > { %v1952_v45 = vmax.f32 %v728_v34, 0.0  ;;  %v730_v47 = vadd.f32 %v729_v41, %v3697_v12  ;;  %v658_v48 = vpop.f32.mrf.mxu0  ;;  %v2225_v49 = vmul.f32 %v3725_v7, %v1921_v31  ;;  %v2348_v50 = vadd.f32 %v2347_v22, %v2224_v37  ;;  %v731_v58 = vpop.f32.mrf.mxu1 }
 0x113   : > { %v1951_v52 = vmax.f32 %v657_v40, 0.0  ;;  %v659_v57 = vadd.f32 %v658_v48, %v3719_v51  ;;  %v2254_v62 = vmul.f32 %v3740_v36, %v1950_v39  ;;  %v2335_v63 = vadd.f32 %v2334_v30, %v2223_v42 }
 0x114   : > { %v1953_v1 = vmax.f32 %v730_v47, 0.0  ;;  %v732_v2 = vadd.f32 %v731_v58, %v3719_v51  ;;  %v660_v3 = vpop.f32.mrf.mxu0  ;;  %v2256_v6 = vmul.f32 %v3740_v36, %v1952_v45  ;;  %v2361_v9 = vadd.f32 %v2360_v38, %v2225_v49  ;;  %v733_v13 = vpop.f32.mrf.mxu1 }
 0x115   : > { %v1982_v10 = vmax.f32 %v659_v57, 0.0  ;;  %v661_v11 = vadd.f32 %v660_v3, %v3719_v51  ;;  %v2255_v14 = vmul.f32 %v3740_v36, %v1951_v52  ;;  %v2323_v15 = vadd.f32 %v2322_v43, %v2254_v62 }
 0x116   : > { %v1984_v16 = vmax.f32 %v732_v2, 0.0  ;;  %v734_v18 = vadd.f32 %v733_v13, %v3719_v51  ;;  %v770_v19 = vpop.f32.mrf.mxu0  ;;  %3162 = vmatmul.mubr.msk.bf16.vlgmr.msra.gmra.mxu0 %vm577_vm0, %v3386_v46  ;;  %v2257_v20 = vmul.f32 %v3740_v36, %v1953_v1  ;;  %v2349_v21 = vadd.f32 %v2348_v50, %v2256_v6  ;;  %v843_v25 = vpop.f32.mrf.mxu1  ;;  %3166 = vmatmul.mubr.msk.bf16.vlgmr.msra.gmra.mxu1 %vm577_vm0, %v3386_v46 }
 0x117   : > { %v1983_v22 = vmax.f32 %v661_v11, 0.0  ;;  %v771_v23 = vadd.f32 %v770_v19, %v3629_v53  ;;  %1654 = vmatprep.mubr.bf16.mxu0 %v3229_v32  ;;  %v2286_v26 = vmul.f32 %v3751_v4, %v1982_v10  ;;  %v2336_v29 = vadd.f32 %v2335_v63, %v2255_v14  ;;  %1727 = vmatprep.mubr.bf16.mxu1 %v3229_v32 }
 0x118   : > { %v1985_v30 = vmax.f32 %v734_v18, 0.0  ;;  %v844_v31 = vadd.f32 %v843_v25, %v3629_v53  ;;  %v772_v34 = vpop.f32.mrf.mxu0  ;;  %v2288_v35 = vmul.f32 %v3751_v4, %v1984_v16  ;;  %v3768_v37 = vadd.f32 %v2361_v9, %v2257_v20  ;;  %v845_v40 = vpop.f32.mrf.mxu1 }
 0x119   : > { %v1762_v38 = vmax.f32 %v771_v23, 0.0  ;;  %v773_v39 = vadd.f32 %v772_v34, %v3629_v53  ;;  %v2287_v46 = vmul.f32 %v3751_v4, %v1983_v22  ;;  %v2324_v41 = vadd.f32 %v2323_v15, %v2286_v26 }
 0x11a   : > { %v1764_v42 = vmax.f32 %v844_v31, 0.0  ;;  %v846_v43 = vadd.f32 %v845_v40, %v3629_v53  ;;  %v774_v45 = vpop.f32.mrf.mxu0  ;;  %v3774_v47 = vmul.f32 %v3751_v4, %v1985_v30  ;;  %v3776_v48 = vadd.f32 %v2349_v21, %v2288_v35  ;;  %v847_v57 = vpop.f32.mrf.mxu1 }
 0x11b   : > { %v2066_v49 = vmul.f32 %v3643_v60, %v1762_v38  ;;  %v1763_v50 = vmax.f32 %v773_v39, 0.0  ;;  %v775_v52 = vadd.f32 %v774_v45, %v3635_v55  ;;  %v2325_v58 = vrot.slane %v2324_v41, 4 }
 0x11c   : > { %v2068_v62 = vmul.f32 %v3643_v60, %v1764_v42  ;;  %v1765_v63 = vmax.f32 %v846_v43, 0.0  ;;  %v848_v1 = vadd.f32 %v847_v57, %v3635_v55  ;;  %v776_v2 = vpop.f32.mrf.mxu0  ;;  %v2337_v3 = vadd.f32 %v2336_v29, %v2287_v46  ;;  %v849_v11 = vpop.f32.mrf.mxu1 }
 0x11d   : > { %v2067_v6 = vmul.f32 %v3643_v60, %v1763_v50  ;;  %v1794_v9 = vmax.f32 %v775_v52, 0.0  ;;  %v777_v10 = vadd.f32 %v776_v2, %v3635_v55  ;;  %v3784_v13 = vadd.f32 %v2325_v58, %v2324_v41 }
 0x11e   : > { %v2069_v14 = vmul.f32 %v3643_v60, %v1765_v63  ;;  %v1796_v15 = vmax.f32 %v848_v1, 0.0  ;;  %v850_v16 = vadd.f32 %v849_v11, %v3635_v55  ;;  %v780_v18 = vpop.f32.mrf.mxu0  ;;  %3163 = vmatmul.mubr.msk.bf16.gmra.mxu0 %vm577_vm0, %v3422_v59  ;;  %v2338_v19 = vrot.slane %v2337_v3, 4  ;;  %v853_v23 = vpop.f32.mrf.mxu1  ;;  %3167 = vmatmul.mubr.msk.bf16.gmra.mxu1 %vm577_vm0, %v3422_v59 }
 0x11f   : > { %v2098_v20 = vmul.f32 %v3645_v61, %v1794_v9  ;;  %v1795_v21 = vmax.f32 %v777_v10, 0.0  ;;  %v781_v22 = vadd.f32 %v780_v18, %v3631_v54  ;;  %1664 = vmatprep.mubr.bf16.mxu0 %v3229_v32  ;;  %v2327_v25 = vrot.slane %v3784_v13, 2  ;;  %1737 = vmatprep.mubr.bf16.mxu1 %v3229_v32 }
 0x120   : > { %v2100_v26 = vmul.f32 %v3645_v61, %v1796_v15  ;;  %v1797_v29 = vmax.f32 %v850_v16, 0.0  ;;  %v854_v30 = vadd.f32 %v853_v23, %v3631_v54  ;;  %v782_v31 = vpop.f32.mrf.mxu0  ;;  %v3799_v34 = vadd.f32 %v2338_v19, %v2337_v3  ;;  %v855_v40 = vpop.f32.mrf.mxu1 }
 0x121   : > { %v2370_v35 = vadd.f32 %v2098_v20, %v2066_v49  ;;  %v2099_v38 = vmul.f32 %v3645_v61, %v1795_v21  ;;  %v1826_v39 = vmax.f32 %v781_v22, 0.0  ;;  %v783_v59 = vadd.f32 %v782_v31, %v3631_v54 }
 0x122   : > { %v2396_v46 = vadd.f32 %v2100_v26, %v2068_v62  ;;  %v2101_v41 = vmul.f32 %v3645_v61, %v1797_v29  ;;  %v1828_v42 = vmax.f32 %v854_v30, 0.0  ;;  %v856_v43 = vadd.f32 %v855_v40, %v3631_v54  ;;  %v784_v45 = vpop.f32.mrf.mxu0  ;;  %v857_v49 = vpop.f32.mrf.mxu1 }
 0x123   : > { %v2383_v50 = vadd.f32 %v2099_v38, %v2067_v6  ;;  %v2130_v52 = vmul.f32 %v3661_v17, %v1826_v39  ;;  %v1827_v57 = vmax.f32 %v783_v59, 0.0  ;;  %v785_v58 = vadd.f32 %v784_v45, %v3637_v56 }
 0x124   : > { %v2409_v63 = vadd.f32 %v2101_v41, %v2069_v14  ;;  %v2132_v1 = vmul.f32 %v3661_v17, %v1828_v42  ;;  %v1829_v2 = vmax.f32 %v856_v43, 0.0  ;;  %v858_v3 = vadd.f32 %v857_v49, %v3637_v56  ;;  %v786_v62 = vpop.f32.mrf.mxu0  ;;  %v859_v6 = vpop.f32.mrf.mxu1 }
 0x125   : > { %v2371_v9 = vadd.f32 %v2370_v35, %v2130_v52  ;;  %v2131_v10 = vmul.f32 %v3661_v17, %v1827_v57  ;;  %v1858_v11 = vmax.f32 %v785_v58, 0.0  ;;  %v787_v15 = vadd.f32 %v786_v62, %v3637_v56 }
 0x126   : > { %v2397_v16 = vadd.f32 %v2396_v46, %v2132_v1  ;;  %v2133_v18 = vmul.f32 %v3661_v17, %v1829_v2  ;;  %v1860_v19 = vmax.f32 %v858_v3, 0.0  ;;  %v860_v20 = vadd.f32 %v859_v6, %v3637_v56  ;;  %v790_v14 = vpop.f32.mrf.mxu0  ;;  %3164 = vmatmul.mubr.msk.bf16.gmra.mxu0 %vm577_vm0, %v3445_v0  ;;  %v863_v29 = vpop.f32.mrf.mxu1  ;;  %3168 = vmatmul.mubr.msk.bf16.gmra.mxu1 %vm577_vm0, %v3445_v0 }
 0x127   : > { %v2384_v21 = vadd.f32 %v2383_v50, %v2131_v10  ;;  %v2162_v22 = vmul.f32 %v3686_v44, %v1858_v11  ;;  %v1859_v23 = vmax.f32 %v787_v15, 0.0  ;;  %v791_v26 = vadd.f32 %v790_v14, %v3656_v8  ;;  %1674 = vmatprep.mubr.bf16.mxu0 %v3229_v32  ;;  %1747 = vmatprep.mubr.bf16.mxu1 %v3229_v32 }
 0x128   : > { %v2410_v30 = vadd.f32 %v2409_v63, %v2133_v18  ;;  %v2164_v31 = vmul.f32 %v3686_v44, %v1860_v19  ;;  %v1861_v35 = vmax.f32 %v860_v20, 0.0  ;;  %v864_v38 = vadd.f32 %v863_v29, %v3656_v8  ;;  %v792_v39 = vpop.f32.mrf.mxu0  ;;  %v865_v42 = vpop.f32.mrf.mxu1 }
 0x129   : > { %v2372_v59 = vadd.f32 %v2371_v9, %v2162_v22  ;;  %v2163_v40 = vmul.f32 %v3686_v44, %v1859_v23  ;;  %v1890_v46 = vmax.f32 %v791_v26, 0.0  ;;  %v793_v41 = vadd.f32 %v792_v39, %v3656_v8 }
 0x12a   : > { %v2398_v43 = vadd.f32 %v2397_v16, %v2164_v31  ;;  %v2165_v0 = vmul.f32 %v3686_v44, %v1861_v35  ;;  %v1892_v45 = vmax.f32 %v864_v38, 0.0  ;;  %v866_v50 = vadd.f32 %v865_v42, %v3656_v8  ;;  %v794_v52 = vpop.f32.mrf.mxu0  ;;  %v867_v63 = vpop.f32.mrf.mxu1 }
 0x12b   : > { %v2385_v57 = vadd.f32 %v2384_v21, %v2163_v40  ;;  %v2194_v58 = vmul.f32 %v3705_v24, %v1890_v46  ;;  %v1891_v49 = vmax.f32 %v793_v41, 0.0  ;;  %v795_v32 = vadd.f32 %v794_v52, %v3674_v33 }
 0x12c   : > { %v2411_v1 = vadd.f32 %v2410_v30, %v2165_v0  ;;  %v2196_v2 = vmul.f32 %v3705_v24, %v1892_v45  ;;  %v1893_v3 = vmax.f32 %v866_v50, 0.0  ;;  %v868_v62 = vadd.f32 %v867_v63, %v3674_v33  ;;  %v796_v9 = vpop.f32.mrf.mxu0  ;;  %v869_v16 = vpop.f32.mrf.mxu1 }
 0x12d   : > { %v2373_v10 = vadd.f32 %v2372_v59, %v2194_v58  ;;  %v2195_v11 = vmul.f32 %v3705_v24, %v1891_v49  ;;  %v1922_v15 = vmax.f32 %v795_v32, 0.0  ;;  %v797_v6 = vadd.f32 %v796_v9, %v3674_v33 }
 0x12e   : > { %v2399_v18 = vadd.f32 %v2398_v43, %v2196_v2  ;;  %v2197_v19 = vmul.f32 %v3705_v24, %v1893_v3  ;;  %v1924_v20 = vmax.f32 %v868_v62, 0.0  ;;  %v870_v14 = vadd.f32 %v869_v16, %v3674_v33  ;;  %v800_v21 = vpop.f32.mrf.mxu0  ;;  %3165 = vmatmul.mubr.msk.bf16.gmra.mxu0 %vm577_vm0, %v3468_v5  ;;  %v873_v30 = vpop.f32.mrf.mxu1  ;;  %3169 = vmatmul.mubr.msk.bf16.gmra.mxu1 %vm577_vm0, %v3468_v5 }
 0x12f   : > { %v2386_v22 = vadd.f32 %v2385_v57, %v2195_v11  ;;  %v2226_v23 = vmul.f32 %v3725_v7, %v1922_v15  ;;  %v1923_v26 = vmax.f32 %v797_v6, 0.0  ;;  %v801_v29 = vadd.f32 %v800_v21, %v3697_v12 }
 0x130   : > { %v2412_v31 = vadd.f32 %v2411_v1, %v2197_v19  ;;  %v2228_v35 = vmul.f32 %v3725_v7, %v1924_v20  ;;  %v1925_v38 = vmax.f32 %v870_v14, 0.0  ;;  %v874_v39 = vadd.f32 %v873_v30, %v3697_v12  ;;  %v802_v59 = vpop.f32.mrf.mxu0  ;;  %v875_v43 = vpop.f32.mrf.mxu1 }
 0x131   : > { %v2374_v40 = vadd.f32 %v2373_v10, %v2226_v23  ;;  %v2227_v46 = vmul.f32 %v3725_v7, %v1923_v26  ;;  %v1954_v41 = vmax.f32 %v801_v29, 0.0  ;;  %v803_v42 = vadd.f32 %v802_v59, %v3697_v12 }
 0x132   : > { %v2400_v0 = vadd.f32 %v2399_v18, %v2228_v35  ;;  %v2229_v45 = vmul.f32 %v3725_v7, %v1925_v38  ;;  %v1956_v50 = vmax.f32 %v874_v39, 0.0  ;;  %v876_v5 = vadd.f32 %v875_v43, %v3697_v12  ;;  %v804_v52 = vpop.f32.mrf.mxu0  ;;  %v877_v63 = vpop.f32.mrf.mxu1 }
 0x133   : > { %v2387_v57 = vadd.f32 %v2386_v22, %v2227_v46  ;;  %v2258_v58 = vmul.f32 %v3740_v36, %v1954_v41  ;;  %v1955_v49 = vmax.f32 %v803_v42, 0.0  ;;  %v805_v32 = vadd.f32 %v804_v52, %v3719_v51 }
 0x134   : > { %v2413_v1 = vadd.f32 %v2412_v31, %v2229_v45  ;;  %v2260_v2 = vmul.f32 %v3740_v36, %v1956_v50  ;;  %v1957_v3 = vmax.f32 %v876_v5, 0.0  ;;  %v878_v62 = vadd.f32 %v877_v63, %v3719_v51  ;;  %v806_v9 = vpop.f32.mrf.mxu0  ;;  %v879_v16 = vpop.f32.mrf.mxu1 }
 0x135   : > { %v2375_v10 = vadd.f32 %v2374_v40, %v2258_v58  ;;  %v2259_v11 = vmul.f32 %v3740_v36, %v1955_v49  ;;  %v1986_v15 = vmax.f32 %v805_v32, 0.0  ;;  %v807_v6 = vadd.f32 %v806_v9, %v3719_v51 }
 0x136   : > { %v2401_v18 = vadd.f32 %v2400_v0, %v2260_v2  ;;  %v2261_v19 = vmul.f32 %v3740_v36, %v1957_v3  ;;  %v1988_v20 = vmax.f32 %v878_v62, 0.0  ;;  %v880_v14 = vadd.f32 %v879_v16, %v3719_v51  ;;  %v916_v21 = vpop.f32.mrf.mxu0  ;;  %v3859_v30 = vpop.f32.mrf.mxu1 }
 0x137   : > { %v2388_v22 = vadd.f32 %v2387_v57, %v2259_v11  ;;  %v2290_v23 = vmul.f32 %v3751_v4, %v1986_v15  ;;  %v1987_v26 = vmax.f32 %v807_v6, 0.0  ;;  %v2328_v29 = vadd.f32 %v2327_v25, %v3784_v13 }
 0x138   : > { %v2414_v31 = vadd.f32 %v2413_v1, %v2261_v19  ;;  %v2292_v35 = vmul.f32 %v3751_v4, %v1988_v20  ;;  %v1989_v38 = vmax.f32 %v880_v14, 0.0  ;;  %v2340_v39 = vrot.slane %v3799_v34, 2  ;;  %v3863_v59 = vpop.f32.mrf.mxu0  ;;  %v3867_v43 = vpop.f32.mrf.mxu1 }
 0x139   : > { %v2376_v40 = vadd.f32 %v2375_v10, %v2290_v23  ;;  %v2291_v46 = vmul.f32 %v3751_v4, %v1987_v26  ;;  %v2329_v41 = vrot.slane %v2328_v29, 1  ;;  %v2351_v42 = vrot.slane %v3776_v48, 4 }
 0x13a   : > { %v2402_v0 = vadd.f32 %v2401_v18, %v2292_v35  ;;  %v2293_v13 = vmul.f32 %v3751_v4, %v1989_v38  ;;  %v2341_v25 = vadd.f32 %v2340_v39, %v3799_v34  ;;  %v2363_v45 = vadd.f32 %v3768_v37, %v3774_v47  ;;  %v3873_v50 = vpop.f32.mrf.mxu0  ;;  %v3876_v49 = vpop.f32.mrf.mxu1 }
 0x13b   : > { %v2377_v5 = vrot.slane %v2376_v40, 4  ;;  %v2389_v52 = vadd.f32 %v2388_v22, %v2291_v46  ;;  %v2330_v57 = vadd.f32 %v2329_v41, %v2328_v29  ;;  %v2352_v58 = vadd.f32 %v2351_v42, %v3776_v48 }
 0x13c   : > { %v2403_v32 = vrot.slane %v2402_v0, 4  ;;  %v2342_v63 = vrot.slane %v2341_v25, 1  ;;  %v2364_v1 = vrot.slane %v2363_v45, 4  ;;  %v2415_v2 = vadd.f32 %v2414_v31, %v2293_v13  ;;  %v3878_v3 = vpop.f32.mrf.mxu0  ;;  %v3881_v47 = vpop.f32.mrf.mxu1 }
 0x13d   : > { %v2378_v62 = vadd.f32 %v2377_v5, %v2376_v40  ;;  %v2390_v34 = vrot.slane %v2389_v52, 4  ;;  %v2353_v9 = vrot.slane %v2352_v58, 2  ;;  %v2736_v37 = vadd.f32 %v3667_v27, %v2330_v57 }
 0x13e   : > { %v2404_v10 = vadd.f32 %v2403_v32, %v2402_v0  ;;  %v2343_v11 = vadd.f32 %v2342_v63, %v2341_v25  ;;  %v2365_v15 = vadd.f32 %v2364_v1, %v2363_v45  ;;  %v2416_v6 = vrot.slane %v2415_v2, 4  ;;  %v3883_v48 = vpop.f32.mrf.mxu0  ;;  %v3886_v14 = vpop.f32.mrf.mxu1 }
 0x13f   : > { %v2379_v16 = vrot.slane %v2378_v62, 2  ;;  %v2391_v18 = vadd.f32 %v2390_v34, %v2389_v52  ;;  %v2354_v19 = vadd.f32 %v2353_v9, %v2352_v58  ;;  %v917_v20 = vadd.f32 %v916_v21, %v3629_v53 }
 0x140   : > { %v2405_v22 = vrot.slane %v2404_v10, 2  ;;  %v2366_v23 = vrot.slane %v2365_v15, 2  ;;  %v2417_v26 = vadd.f32 %v2416_v6, %v2415_v2  ;;  %v2737_v29 = vadd.f32 %v3667_v27, %v2343_v11  ;;  %v3889_v31 = vpop.f32.mrf.mxu0  ;;  %v3891_v46 = vpop.f32.mrf.mxu1 }
 0x141   : > { %v2380_v35 = vadd.f32 %v2379_v16, %v2378_v62  ;;  %v2392_v38 = vrot.slane %v2391_v18, 2  ;;  %v2355_v39 = vrot.slane %v2354_v19, 1  ;;  %v1766_v40 = vmax.f32 %v917_v20, 0.0 }
 0x142   : > { %v2406_v41 = vadd.f32 %v2405_v22, %v2404_v10  ;;  %v2367_v42 = vadd.f32 %v2366_v23, %v2365_v15  ;;  %v2418_v0 = vrot.slane %v2417_v26, 2  ;;  %v2800_v13 = vcombine.low %v2736_v37, %v2737_v29  ;;  %v3893_v21 = vpop.f32.mrf.mxu0  ;;  %v3896_v57 = vpop.f32.mrf.mxu1 }
 0x143   : > { %v2381_v25 = vrot.slane %v2380_v35, 1  ;;  %v2393_v45 = vadd.f32 %v2392_v38, %v2391_v18  ;;  %v2356_v5 = vadd.f32 %v2355_v39, %v2354_v19  ;;  %v2070_v52 = vmul.f32 %v3643_v60, %v1766_v40 }
 0x144   : > { %v2407_v58 = vrot.slane %v2406_v41, 1  ;;  %v2368_v32 = vrot.slane %v2367_v42, 1  ;;  %v2419_v63 = vadd.f32 %v2418_v0, %v2417_v26  ;;  %v2810_v1 = vrot.slane %v2800_v13, %v3669_v28  ;;  %v3899_v2 = vpop.f32.mrf.mxu0  ;;  %v3904_v10 = vpop.f32.mrf.mxu1 }
 0x145   : > { %v2382_v62 = vadd.f32 %v2381_v25, %v2380_v35  ;;  %v2394_v34 = vrot.slane %v2393_v45, 1  ;;  %v2738_v9 = vadd.f32 %v3667_v27, %v2356_v5  ;;  %v990_v37 = vadd.f32 %v3859_v30, %v3629_v53 }
 0x146   : > { %v2408_v11 = vadd.f32 %v2407_v58, %v2406_v41  ;;  %v2369_v15 = vadd.f32 %v2368_v32, %v2367_v42  ;;  %v2420_v6 = vrot.slane %v2419_v63, 1  ;;  %v919_v16 = vadd.f32 %v3863_v59, %v3629_v53  ;;  %v3908_v18 = vpop.f32.mrf.mxu0  ;;  %v3913_v26 = vpop.f32.mrf.mxu1 }
 0x147   : > { %v2740_v19 = vadd.f32 %v3667_v27, %v2382_v62  ;;  %v2395_v20 = vadd.f32 %v2394_v34, %v2393_v45  ;;  %v1768_v22 = vmax.f32 %v990_v37, 0.0  ;;  %v992_v23 = vadd.f32 %v3867_v43, %v3629_v53 }
 0x148   : > { %v2742_v30 = vadd.f32 %v3667_v27, %v2408_v11  ;;  %v2421_v29 = vadd.f32 %v2420_v6, %v2419_v63  ;;  %v2739_v59 = vadd.f32 %v3667_v27, %v2369_v15  ;;  %v1767_v35 = vmax.f32 %v919_v16, 0.0  ;;  %v3921_v38 = vpop.f32.mrf.mxu0  ;;  %v3927_v42 = vpop.f32.mrf.mxu1 }
 0x149   : > { %v2741_v39 = vadd.f32 %v3667_v27, %v2395_v20  ;;  %v2072_v40 = vmul.f32 %v3643_v60, %v1768_v22  ;;  %v1769_v41 = vmax.f32 %v992_v23, 0.0  ;;  %v921_v43 = vadd.f32 %v3873_v50, %v3635_v55 }
 0x14a   : > { %v2743_v0 = vadd.f32 %v3667_v27, %v2421_v29  ;;  %v2801_v13 = vcombine.low %v2738_v9, %v2739_v59  ;;  %v2071_v25 = vmul.f32 %v3643_v60, %v1767_v35  ;;  %v994_v45 = vadd.f32 %v3876_v49, %v3635_v55  ;;  %v3933_v5 = vpop.f32.mrf.mxu0  ;;  %v3939_v62 = vpop.f32.mrf.mxu1 }
 0x14b   : > { %v2802_v58 = vcombine.low %v2740_v19, %v2741_v39  ;;  %v2073_v32 = vmul.f32 %v3643_v60, %v1769_v41  ;;  %v1798_v63 = vmax.f32 %v921_v43, 0.0  ;;  %v923_v50 = vadd.f32 %v3878_v3, %v3635_v55 }
 0x14c   : > { %v2803_v34 = vcombine.low %v2742_v30, %v2743_v0  ;;  %v2817_v9 = vrot.slane %v2801_v13, %v3669_v28  ;;  %v1800_v37 = vmax.f32 %v994_v45, 0.0  ;;  %v996_v49 = vadd.f32 %v3881_v47, %v3635_v55  ;;  %v3944_v11 = vpop.f32.mrf.mxu0  ;;  %v3950_v19 = vpop.f32.mrf.mxu1 }
 0x14d   : > { %v2824_v15 = vrot.slane %v2802_v58, %v3669_v28  ;;  %v2102_v6 = vmul.f32 %v3645_v61, %v1798_v63  ;;  %v1799_v16 = vmax.f32 %v923_v50, 0.0  ;;  %v927_v3 = vadd.f32 %v3883_v48, %v3631_v54 }
 0x14e   : > { %v2831_v20 = vrot.slane %v2803_v34, %v3669_v28  ;;  %v2832_v22 = vcombine.low %v2810_v1, %v2817_v9  ;;  %v2104_v23 = vmul.f32 %v3645_v61, %v1800_v37  ;;  %v1801_v30 = vmax.f32 %v996_v49, 0.0  ;;  %v3954_v29 = vpop.f32.mrf.mxu0  ;;  %v3962_v48 = vpop.f32.mrf.mxu1 }
 0x14f   : > { %v2422_v47 = vadd.f32 %v2102_v6, %v2070_v52  ;;  %v2103_v59 = vmul.f32 %v3645_v61, %v1799_v16  ;;  %v1830_v35 = vmax.f32 %v927_v3, 0.0  ;;  %v1000_v39 = vadd.f32 %v3886_v14, %v3631_v54 }
 0x150   : > { %v2833_v41 = vcombine.low %v2824_v15, %v2831_v20  ;;  %v2840_v43 = vrot.slane %v2832_v22, %v3669_v28  ;;  %v2448_v1 = vadd.f32 %v2104_v23, %v2072_v40  ;;  %v2105_v0 = vmul.f32 %v3645_v61, %v1801_v30  ;;  %v3966_v13 = vpop.f32.mrf.mxu0  ;;  %v3971_v50 = vpop.f32.mrf.mxu1 }
 0x151   : > { %v2435_v45 = vadd.f32 %v2103_v59, %v2071_v25  ;;  %v2134_v58 = vmul.f32 %v3661_v17, %v1830_v35  ;;  %v1832_v52 = vmax.f32 %v1000_v39, 0.0  ;;  %v929_v63 = vadd.f32 %v3889_v31, %v3631_v54 }
 0x152   : > { %v2847_v14 = vrot.slane %v2833_v41, %v3669_v28  ;;  %v2461_v34 = vadd.f32 %v2105_v0, %v2073_v32  ;;  %v1002_v9 = vadd.f32 %v3891_v46, %v3631_v54  ;;  %v931_v40 = vadd.f32 %v3893_v21, %v3637_v56  ;;  %v3978_v37 = vpop.f32.mrf.mxu0  ;;  %v3988_v15 = vpop.f32.mrf.mxu1 }
 0x153   : > { %v2423_v31 = vadd.f32 %v2422_v47, %v2134_v58  ;;  %v2136_v25 = vmul.f32 %v3661_v17, %v1832_v52  ;;  %v1831_v49 = vmax.f32 %v929_v63, 0.0  ;;  %v1004_v32 = vadd.f32 %v3896_v57, %v3637_v56 }
 0x154   : > { %v2848_v46 = vcombine.low %v2840_v43, %v2847_v14  ;;  %v1833_v6 = vmax.f32 %v1002_v9, 0.0  ;;  %v1862_v21 = vmax.f32 %v931_v40, 0.0  ;;  %v933_v16 = vadd.f32 %v3899_v2, %v3637_v56  ;;  %v3992_v3 = vpop.f32.mrf.mxu0  ;;  %v3997_v47 = vpop.f32.mrf.mxu1 }
 0x155   : > { %v2449_v20 = vadd.f32 %v2448_v1, %v2136_v25  ;;  %v2135_v22 = vmul.f32 %v3661_v17, %v1831_v49  ;;  %v1864_v23 = vmax.f32 %v1004_v32, 0.0  ;;  %v1006_v30 = vadd.f32 %v3904_v10, %v3637_v56 }
 0x156   : > { %3000 = vst [vmem:[%s3983_s13] sm:$0xff] %v2848_v46  ;;  %v2137_v57 = vmul.f32 %v3661_v17, %v1833_v6  ;;  %v2166_v59 = vmul.f32 %v3686_v44, %v1862_v21  ;;  %v1863_v35 = vmax.f32 %v933_v16, 0.0  ;;  %v937_v2 = vadd.f32 %v3908_v18, %v3656_v8  ;;  %v4004_v39 = vpop.f32.mrf.mxu0  ;;  %v4009_v0 = vpop.f32.mrf.mxu1 }
 0x157   : > { %v2436_v41 = vadd.f32 %v2435_v45, %v2135_v22  ;;  %v2168_v43 = vmul.f32 %v3686_v44, %v1864_v23  ;;  %v1865_v1 = vmax.f32 %v1006_v30, 0.0  ;;  %v1010_v10 = vadd.f32 %v3913_v26, %v3656_v8 }
 0x158   : > { %v2462_v58 = vadd.f32 %v2461_v34, %v2137_v57  ;;  %v2424_v52 = vadd.f32 %v2423_v31, %v2166_v59  ;;  %v2167_v63 = vmul.f32 %v3686_v44, %v1863_v35  ;;  %v1894_v14 = vmax.f32 %v937_v2, 0.0  ;;  %v4012_v9 = vpop.f32.mrf.mxu0  ;;  %v4017_v49 = vpop.f32.mrf.mxu1 }
 0x159   : > { %v2450_v40 = vadd.f32 %v2449_v20, %v2168_v43  ;;  %v2169_v18 = vmul.f32 %v3686_v44, %v1865_v1  ;;  %v1896_v25 = vmax.f32 %v1010_v10, 0.0  ;;  %v939_v45 = vadd.f32 %v3921_v38, %v3656_v8 }
 0x15a   : > { %v2437_v32 = vadd.f32 %v2436_v41, %v2167_v63  ;;  %v2198_v26 = vmul.f32 %v3705_v24, %v1894_v14  ;;  %v1012_v34 = vadd.f32 %v3927_v42, %v3656_v8  ;;  %v941_v31 = vadd.f32 %v3933_v5, %v3674_v33  ;;  %v4024_v46 = vpop.f32.mrf.mxu0  ;;  %v4029_v20 = vpop.f32.mrf.mxu1 }
 0x15b   : > { %v2463_v6 = vadd.f32 %v2462_v58, %v2169_v18  ;;  %v2200_v21 = vmul.f32 %v3705_v24, %v1896_v25  ;;  %v1895_v16 = vmax.f32 %v939_v45, 0.0  ;;  %v1014_v38 = vadd.f32 %v3939_v62, %v3674_v33 }
 0x15c   : > { %v2425_v22 = vadd.f32 %v2424_v52, %v2198_v26  ;;  %v1897_v23 = vmax.f32 %v1012_v34, 0.0  ;;  %v1926_v30 = vmax.f32 %v941_v31, 0.0  ;;  %v943_v42 = vadd.f32 %v3944_v11, %v3674_v33  ;;  %v4033_v57 = vpop.f32.mrf.mxu0  ;;  %v4038_v41 = vpop.f32.mrf.mxu1 }
 0x15d   : > { %v2451_v5 = vadd.f32 %v2450_v40, %v2200_v21  ;;  %v2199_v59 = vmul.f32 %v3705_v24, %v1895_v16  ;;  %v1928_v35 = vmax.f32 %v1014_v38, 0.0  ;;  %v1016_v2 = vadd.f32 %v3950_v19, %v3674_v33 }
 0x15e   : > { %v2201_v62 = vmul.f32 %v3705_v24, %v1897_v23  ;;  %v2230_v43 = vmul.f32 %v3725_v7, %v1926_v30  ;;  %v1927_v1 = vmax.f32 %v943_v42, 0.0  ;;  %v947_v10 = vadd.f32 %v3954_v29, %v3697_v12  ;;  %v4044_v11 = vpop.f32.mrf.mxu0  ;;  %v4049_v19 = vpop.f32.mrf.mxu1 }
 0x15f   : > { %v2438_v58 = vadd.f32 %v2437_v32, %v2199_v59  ;;  %v2232_v52 = vmul.f32 %v3725_v7, %v1928_v35  ;;  %v1929_v63 = vmax.f32 %v1016_v2, 0.0  ;;  %v1020_v14 = vadd.f32 %v3962_v48, %v3697_v12 }
 0x160   : > { %v2464_v40 = vadd.f32 %v2463_v6, %v2201_v62  ;;  %v2426_v18 = vadd.f32 %v2425_v22, %v2230_v43  ;;  %v2231_v25 = vmul.f32 %v3725_v7, %v1927_v1  ;;  %v1958_v45 = vmax.f32 %v947_v10, 0.0  ;;  %v4052_v26 = vpop.f32.mrf.mxu0  ;;  %v4057_v21 = vpop.f32.mrf.mxu1 }
 0x161   : > { %v2452_v34 = vadd.f32 %v2451_v5, %v2232_v52  ;;  %v2233_v29 = vmul.f32 %v3725_v7, %v1929_v63  ;;  %v1960_v31 = vmax.f32 %v1020_v14, 0.0  ;;  %v949_v32 = vadd.f32 %v3966_v13, %v3697_v12 }
 0x162   : > { %v2439_v16 = vadd.f32 %v2438_v58, %v2231_v25  ;;  %v2262_v48 = vmul.f32 %v3740_v36, %v1958_v45  ;;  %v1022_v6 = vadd.f32 %v3971_v50, %v3697_v12  ;;  %v951_v38 = vadd.f32 %v3978_v37, %v3719_v51  ;;  %v4064_v22 = vpop.f32.mrf.mxu0  ;;  %v4069_v5 = vpop.f32.mrf.mxu1 }
 0x163   : > { %v2465_v23 = vadd.f32 %v2464_v40, %v2233_v29  ;;  %v2264_v30 = vmul.f32 %v3740_v36, %v1960_v31  ;;  %v1959_v42 = vmax.f32 %v949_v32, 0.0  ;;  %v1024_v13 = vadd.f32 %v3988_v15, %v3719_v51 }
 0x164   : > { %v2427_v59 = vadd.f32 %v2426_v18, %v2262_v48  ;;  %v1961_v35 = vmax.f32 %v1022_v6, 0.0  ;;  %v1990_v2 = vmax.f32 %v951_v38, 0.0  ;;  %v953_v50 = vadd.f32 %v3992_v3, %v3719_v51  ;;  %v4073_v62 = vpop.f32.mrf.mxu0  ;;  %v4078_v58 = vpop.f32.mrf.mxu1 }
 0x165   : > { %v2453_v37 = vadd.f32 %v2452_v34, %v2264_v30  ;;  %v2263_v43 = vmul.f32 %v3740_v36, %v1959_v42  ;;  %v1992_v1 = vmax.f32 %v1024_v13, 0.0  ;;  %v1026_v10 = vadd.f32 %v3997_v47, %v3719_v51 }
 0x166   : > { %v2265_v15 = vmul.f32 %v3740_v36, %v1961_v35  ;;  %v2294_v52 = vmul.f32 %v3751_v4, %v1990_v2  ;;  %v1991_v63 = vmax.f32 %v953_v50, 0.0  ;;  %v1063_v14 = vadd.f32 %v4004_v39, %v3629_v53  ;;  %v4084_v3 = vpop.f32.mrf.mxu0  ;;  %v4089_v47 = vpop.f32.mrf.mxu1 }
 0x167   : > { %v2440_v40 = vadd.f32 %v2439_v16, %v2263_v43  ;;  %v2296_v18 = vmul.f32 %v3751_v4, %v1992_v1  ;;  %v1993_v25 = vmax.f32 %v1026_v10, 0.0  ;;  %v1136_v45 = vadd.f32 %v4009_v0, %v3629_v53 }
 0x168   : > { %v2466_v34 = vadd.f32 %v2465_v23, %v2265_v15  ;;  %v2428_v29 = vadd.f32 %v2427_v59, %v2294_v52  ;;  %v2295_v31 = vmul.f32 %v3751_v4, %v1991_v63  ;;  %v1770_v32 = vmax.f32 %v1063_v14, 0.0  ;;  %v4092_v48 = vpop.f32.mrf.mxu0  ;;  %v4097_v30 = vpop.f32.mrf.mxu1 }
 0x169   : > { %v2454_v6 = vadd.f32 %v2453_v37, %v2296_v18  ;;  %v2297_v39 = vmul.f32 %v3751_v4, %v1993_v25  ;;  %v1772_v38 = vmax.f32 %v1136_v45, 0.0  ;;  %v1065_v16 = vadd.f32 %v4012_v9, %v3629_v53 }
 0x16a   : > { %v2429_v42 = vrot.slane %v2428_v29, 4  ;;  %v2441_v0 = vadd.f32 %v2440_v40, %v2295_v31  ;;  %v1138_v23 = vadd.f32 %v4017_v49, %v3629_v53  ;;  %v4101_v13 = vpop.f32.mrf.mxu0  ;;  %v2074_v2 = vmul.f32 %v3643_v60, %v1770_v32  ;;  %v4104_v50 = vpop.f32.mrf.mxu1 }
 0x16b   : > { %v2455_v59 = vrot.slane %v2454_v6, 4  ;;  %v2467_v35 = vadd.f32 %v2466_v34, %v2297_v39  ;;  %v2076_v1 = vmul.f32 %v3643_v60, %v1772_v38  ;;  %v1067_v9 = vadd.f32 %v4024_v46, %v3635_v55 }
 0x16c   : > { %v2430_v37 = vadd.f32 %v2429_v42, %v2428_v29  ;;  %v2442_v43 = vrot.slane %v2441_v0, 4  ;;  %v4109_v10 = vpop.f32.mrf.mxu0  ;;  %v1771_v49 = vmax.f32 %v1065_v16, 0.0  ;;  %v1140_v63 = vadd.f32 %v4029_v20, %v3635_v55  ;;  %v4113_v14 = vpop.f32.mrf.mxu1 }
 0x16d   : > { %v2456_v15 = vadd.f32 %v2455_v59, %v2454_v6  ;;  %v2468_v52 = vrot.slane %v2467_v35, 4  ;;  %v1773_v25 = vmax.f32 %v1138_v23, 0.0  ;;  %v1802_v45 = vmax.f32 %v1067_v9, 0.0 }
 0x16e   : > { %v2431_v40 = vrot.slane %v2430_v37, 2  ;;  %v2443_v18 = vadd.f32 %v2442_v43, %v2441_v0  ;;  %v4115_v34 = vpop.f32.mrf.mxu0  ;;  %v1804_v32 = vmax.f32 %v1140_v63, 0.0  ;;  %v1069_v46 = vadd.f32 %v4033_v57, %v3635_v55  ;;  %v4119_v6 = vpop.f32.mrf.mxu1 }
 0x16f   : > { %v2457_v29 = vrot.slane %v2456_v15, 2  ;;  %v2469_v31 = vadd.f32 %v2468_v52, %v2467_v35  ;;  %v2106_v20 = vmul.f32 %v3645_v61, %v1802_v45  ;;  %v1142_v16 = vadd.f32 %v4038_v41, %v3635_v55 }
 0x170   : > { %v2432_v39 = vadd.f32 %v2431_v40, %v2430_v37  ;;  %v2444_v38 = vrot.slane %v2443_v18, 2  ;;  %v4124_v42 = vpop.f32.mrf.mxu0  ;;  %v2108_v59 = vmul.f32 %v3645_v61, %v1804_v32  ;;  %v1803_v35 = vmax.f32 %v1069_v46, 0.0  ;;  %v4127_v43 = vpop.f32.mrf.mxu1 }
 0x171   : > { %v2458_v0 = vadd.f32 %v2457_v29, %v2456_v15  ;;  %v2470_v23 = vrot.slane %v2469_v31, 2  ;;  %v2075_v52 = vmul.f32 %v3643_v60, %v1771_v49  ;;  %v1805_v37 = vmax.f32 %v1142_v16, 0.0 }
 0x172   : > { %v2433_v9 = vrot.slane %v2432_v39, 1  ;;  %v2445_v57 = vadd.f32 %v2444_v38, %v2443_v18  ;;  %v4130_v63 = vpop.f32.mrf.mxu0  ;;  %v2077_v41 = vmul.f32 %v3643_v60, %v1773_v25  ;;  %v2474_v55 = vadd.f32 %v2106_v20, %v2074_v2  ;;  %v4133_v53 = vpop.f32.mrf.mxu1 }
 0x173   : > { %v2459_v40 = vrot.slane %v2458_v0, 1  ;;  %v2471_v45 = vadd.f32 %v2470_v23, %v2469_v31  ;;  %v2500_v32 = vadd.f32 %v2108_v59, %v2076_v1  ;;  %v1073_v46 = vadd.f32 %v4044_v11, %v3631_v54 }
 0x174   : > { %v2434_v15 = vadd.f32 %v2433_v9, %v2432_v39  ;;  %v2446_v29 = vrot.slane %v2445_v57, 1  ;;  %v4137_v4 = vpop.f32.mrf.mxu0  ;;  %v2107_v38 = vmul.f32 %v3645_v61, %v1803_v35  ;;  %v1146_v31 = vadd.f32 %v4049_v19, %v3631_v54  ;;  %v4142_v16 = vpop.f32.mrf.mxu1 }
 0x175   : > { %v2460_v18 = vadd.f32 %v2459_v40, %v2458_v0  ;;  %v2472_v49 = vrot.slane %v2471_v45, 1  ;;  %v2109_v39 = vmul.f32 %v3645_v61, %v1805_v37  ;;  %v1834_v1 = vmax.f32 %v1073_v46, 0.0 }
 0x176   : > { %v2744_v2 = vadd.f32 %v3667_v27, %v2434_v15  ;;  %v2447_v25 = vadd.f32 %v2446_v29, %v2445_v57  ;;  %v4146_v20 = vpop.f32.mrf.mxu0  ;;  %v1836_v0 = vmax.f32 %v1146_v31, 0.0  ;;  %v1075_v59 = vadd.f32 %v4052_v26, %v3631_v54  ;;  %v4151_v35 = vpop.f32.mrf.mxu1 }
 0x177   : > { %v2746_v11 = vadd.f32 %v3667_v27, %v2460_v18  ;;  %v2473_v23 = vadd.f32 %v2472_v49, %v2471_v45  ;;  %v2138_v9 = vmul.f32 %v3661_v17, %v1834_v1  ;;  %v1148_v57 = vadd.f32 %v4057_v21, %v3631_v54 }
 0x178   : > { %v2745_v19 = vadd.f32 %v3667_v27, %v2447_v25  ;;  %v1077_v37 = vadd.f32 %v4064_v22, %v3637_v56  ;;  %v4159_v40 = vpop.f32.mrf.mxu0  ;;  %v2140_v15 = vmul.f32 %v3661_v17, %v1836_v0  ;;  %v1835_v29 = vmax.f32 %v1075_v59, 0.0  ;;  %v4165_v46 = vpop.f32.mrf.mxu1 }
 0x179   : > { %v2747_v45 = vadd.f32 %v3667_v27, %v2473_v23  ;;  %v1150_v26 = vadd.f32 %v4069_v5, %v3637_v56  ;;  %v2487_v49 = vadd.f32 %v2107_v38, %v2075_v52  ;;  %v1837_v31 = vmax.f32 %v1148_v57, 0.0 }
 0x17a   : > { %v2849_v18 = vcombine.low %v2744_v2, %v2745_v19  ;;  %v1866_v25 = vmax.f32 %v1077_v37, 0.0  ;;  %v4167_v21 = vpop.f32.mrf.mxu0  ;;  %v2513_v22 = vadd.f32 %v2109_v39, %v2077_v41  ;;  %v2139_v54 = vmul.f32 %v3661_v17, %v1835_v29  ;;  %v4170_v23 = vpop.f32.mrf.mxu1 }
 0x17b   : > { %v2850_v1 = vcombine.low %v2746_v11, %v2747_v45  ;;  %v1868_v61 = vmax.f32 %v1150_v26, 0.0  ;;  %v2475_v0 = vadd.f32 %v2474_v55, %v2138_v9  ;;  %v2141_v59 = vmul.f32 %v3661_v17, %v1837_v31 }
 0x17c   : > { %v2170_v5 = vmul.f32 %v3686_v44, %v1866_v25  ;;  %v1079_v2 = vadd.f32 %v4073_v62, %v3637_v56  ;;  %v4176_v52 = vpop.f32.mrf.mxu0  ;;  %v4179_v38 = vrot.slane %v2849_v18, %v3669_v28  ;;  %v2501_v39 = vadd.f32 %v2500_v32, %v2140_v15  ;;  %v4186_v55 = vpop.f32.mrf.mxu1 }
 0x17d   : > { %v4182_v41 = vrot.slane %v2850_v1, %v3669_v28  ;;  %v1152_v11 = vadd.f32 %v4078_v58, %v3637_v56  ;;  %v2488_v19 = vadd.f32 %v2487_v49, %v2139_v54  ;;  %v2172_v9 = vmul.f32 %v3686_v44, %v1868_v61 }
 0x17e   : > { %v1867_v57 = vmax.f32 %v1079_v2, 0.0  ;;  %v1083_v62 = vadd.f32 %v4084_v3, %v3656_v8  ;;  %v4191_v37 = vpop.f32.mrf.mxu0  ;;  %v2514_v45 = vadd.f32 %v2513_v22, %v2141_v59  ;;  %v2476_v29 = vadd.f32 %v2475_v0, %v2170_v5  ;;  %v4195_v15 = vpop.f32.mrf.mxu1 }
 0x17f   : > { %v1869_v26 = vmax.f32 %v1152_v11, 0.0  ;;  %v1156_v32 = vadd.f32 %v4089_v47, %v3656_v8  ;;  %v1085_v54 = vadd.f32 %v4092_v48, %v3656_v8  ;;  %v1158_v61 = vadd.f32 %v4097_v30, %v3656_v8 }
 0x180   : > { %v2171_v58 = vmul.f32 %v3686_v44, %v1867_v57  ;;  %v1898_v18 = vmax.f32 %v1083_v62, 0.0  ;;  %v4202_v3 = vpop.f32.mrf.mxu0  ;;  %v1087_v47 = vadd.f32 %v4101_v13, %v3674_v33  ;;  %v4209_v1 = vpop.f32.mrf.mxu1  ;;  %v2502_v22 = vadd.f32 %v2501_v39, %v2172_v9 }
 0x181   : > { %v2173_v31 = vmul.f32 %v3686_v44, %v1869_v26  ;;  %v1900_v25 = vmax.f32 %v1156_v32, 0.0  ;;  %v1899_v48 = vmax.f32 %v1085_v54, 0.0  ;;  %v1901_v59 = vmax.f32 %v1158_v61, 0.0 }
 0x182   : > { %v2202_v0 = vmul.f32 %v3705_v24, %v1898_v18  ;;  %v4212_v5 = vpop.f32.mrf.mxu0  ;;  %v2489_v30 = vadd.f32 %v2488_v19, %v2171_v58  ;;  %v1930_v11 = vmax.f32 %v1087_v47, 0.0  ;;  %v1160_v57 = vadd.f32 %v4104_v50, %v3674_v33  ;;  %v4217_v62 = vpop.f32.mrf.mxu1 }
 0x183   : > { %v2204_v2 = vmul.f32 %v3705_v24, %v1900_v25  ;;  %v2515_v26 = vadd.f32 %v2514_v45, %v2173_v31  ;;  %v2203_v13 = vmul.f32 %v3705_v24, %v1899_v48  ;;  %v2205_v39 = vmul.f32 %v3705_v24, %v1901_v59 }
 0x184   : > { %v1089_v9 = vadd.f32 %v4109_v10, %v3674_v33  ;;  %v4223_v32 = vpop.f32.mrf.mxu0  ;;  %v2477_v18 = vadd.f32 %v2476_v29, %v2202_v0  ;;  %v2234_v19 = vmul.f32 %v3725_v7, %v1930_v11  ;;  %v1932_v58 = vmax.f32 %v1160_v57, 0.0  ;;  %v4228_v50 = vpop.f32.mrf.mxu1 }
 0x185   : > { %v1162_v54 = vadd.f32 %v4113_v14, %v3674_v33  ;;  %v2503_v61 = vadd.f32 %v2502_v22, %v2204_v2  ;;  %v2490_v45 = vadd.f32 %v2489_v30, %v2203_v13  ;;  %v1093_v25 = vadd.f32 %v4115_v34, %v3697_v12 }
 0x186   : > { %v1931_v31 = vmax.f32 %v1089_v9, 0.0  ;;  %v4232_v47 = vpop.f32.mrf.mxu0  ;;  %v2516_v10 = vadd.f32 %v2515_v26, %v2205_v39  ;;  %v2236_v48 = vmul.f32 %v3725_v7, %v1932_v58  ;;  %v1166_v0 = vadd.f32 %v4119_v6, %v3697_v12  ;;  %v4237_v59 = vpop.f32.mrf.mxu1 }
 0x187   : > { %v1933_v29 = vmax.f32 %v1162_v54, 0.0  ;;  %v1962_v11 = vmax.f32 %v1093_v25, 0.0  ;;  %v1095_v22 = vadd.f32 %v4124_v42, %v3697_v12  ;;  %v1168_v34 = vadd.f32 %v4127_v43, %v3697_v12 }
 0x188   : > { %v2235_v14 = vmul.f32 %v3725_v7, %v1931_v31  ;;  %v4244_v30 = vpop.f32.mrf.mxu0  ;;  %v2478_v2 = vadd.f32 %v2477_v18, %v2234_v19  ;;  %v1964_v26 = vmax.f32 %v1166_v0, 0.0  ;;  %v1097_v6 = vadd.f32 %v4130_v63, %v3719_v51  ;;  %v4249_v13 = vpop.f32.mrf.mxu1 }
 0x189   : > { %v2237_v57 = vmul.f32 %v3725_v7, %v1933_v29  ;;  %v2504_v39 = vadd.f32 %v2503_v61, %v2236_v48  ;;  %v2266_v9 = vmul.f32 %v3740_v36, %v1962_v11  ;;  %v1963_v58 = vmax.f32 %v1095_v22, 0.0 }
 0x18a   : > { %v1965_v54 = vmax.f32 %v1168_v34, 0.0  ;;  %v4252_v42 = vpop.f32.mrf.mxu0  ;;  %v2491_v31 = vadd.f32 %v2490_v45, %v2235_v14  ;;  %v2268_v43 = vmul.f32 %v3740_v36, %v1964_v26  ;;  %v1994_v25 = vmax.f32 %v1097_v6, 0.0  ;;  %v4257_v19 = vpop.f32.mrf.mxu1  ;;  %v4956_v45 = vld [vmem:[#allocation10_spill] sm:$0xff] }
 0x18b   : > { %v1170_v18 = vadd.f32 %v4133_v53, %v3719_v51  ;;  %v2517_v29 = vadd.f32 %v2516_v10, %v2237_v57  ;;  %v2479_v63 = vadd.f32 %v2478_v2, %v2266_v9  ;;  %v2267_v0 = vmul.f32 %v3740_v36, %v1963_v58  ;;  %v4957_v57 = vld [vmem:[#allocation4_spill] sm:$0xff] }
 0x18c   : > { %v1099_v61 = vadd.f32 %v4137_v4, %v3719_v51  ;;  %v4262_v48 = vpop.f32.mrf.mxu0  ;;  %v2269_v11 = vmul.f32 %v3740_v36, %v1965_v54  ;;  %v2298_v14 = vmul.f32 %v4956_v45, %v1994_v25  ;;  %v1172_v34 = vadd.f32 %v4142_v16, %v3719_v51  ;;  %v4268_v53 = vpop.f32.mrf.mxu1 }
 0x18d   : > { %v1996_v22 = vmax.f32 %v1170_v18, 0.0  ;;  %v2505_v26 = vadd.f32 %v2504_v39, %v2268_v43  ;;  %v2492_v10 = vadd.f32 %v2491_v31, %v2267_v0  ;;  %v1209_v6 = vadd.f32 %v4146_v20, %v4957_v57 }
 0x18e   : > { %v1995_v2 = vmax.f32 %v1099_v61, 0.0  ;;  %v4272_v9 = vpop.f32.mrf.mxu0  ;;  %v2480_v4 = vadd.f32 %v2479_v63, %v2298_v14  ;;  %v1997_v54 = vmax.f32 %v1172_v34, 0.0  ;;  %v1282_v25 = vadd.f32 %v4151_v35, %v4957_v57  ;;  %v4277_v18 = vpop.f32.mrf.mxu1 }
 0x18f   : > { %v2300_v58 = vmul.f32 %v4956_v45, %v1996_v22  ;;  %v1774_v49 = vmax.f32 %v1209_v6, 0.0  ;;  %v1211_v39 = vadd.f32 %v4159_v40, %v4957_v57  ;;  %v1284_v20 = vadd.f32 %v4165_v46, %v4957_v57 }
 0x190   : > { %v2299_v16 = vmul.f32 %v4956_v45, %v1995_v2  ;;  %v4284_v31 = vpop.f32.mrf.mxu0  ;;  %v2518_v43 = vadd.f32 %v2517_v29, %v2269_v11  ;;  %v2481_v63 = vrot.slane %v2480_v4, 4  ;;  %v2301_v61 = vmul.f32 %v4956_v45, %v1997_v54  ;;  %v4287_v14 = vpop.f32.mrf.mxu1  ;;  %v4961_v45 = vld [vmem:[#allocation6_spill] sm:$0xff] }
 0x191   : > { %v2506_v0 = vadd.f32 %v2505_v26, %v2300_v58  ;;  %v4958_v35 = vcombine.low %v4179_v38, %v4182_v41  ;;  %v1776_v40 = vmax.f32 %v1282_v25, 0.0  ;;  %v2078_v29 = vmul.f32 %v3643_v60, %v1774_v49 }
 0x192   : > { %v2493_v34 = vadd.f32 %v2492_v10, %v2299_v16  ;;  %v4295_v2 = vpop.f32.mrf.mxu0  ;;  %v2482_v46 = vadd.f32 %v2481_v63, %v2480_v4  ;;  %v2519_v57 = vadd.f32 %v2518_v43, %v2301_v61  ;;  %v4298_v11 = vpop.f32.mrf.mxu1  ;;  %v1775_v58 = vmax.f32 %v1211_v39, 0.0 }
 0x193   : > { %v4293_v22 = vrot.slane %v4958_v35, %v3669_v28  ;;  %4959 = vst [vmem:[#allocation11_spill] sm:$0xff] %v4295_v2  ;;  %v2507_v6 = vrot.slane %v2506_v0, 4  ;;  %4960 = vst [vmem:[#allocation12_spill] sm:$0xff] %v4298_v11  ;;  %v1777_v54 = vmax.f32 %v1284_v20, 0.0  ;;  %v1213_v36 = vadd.f32 %v4167_v21, %v4961_v45 }
 0x194   : > { %v2494_v26 = vrot.slane %v2493_v34, 4  ;;  %v4302_v38 = vpop.f32.mrf.mxu0  ;;  %v2483_v41 = vrot.slane %v2482_v46, 2  ;;  %v2520_v25 = vrot.slane %v2519_v57, 4  ;;  %v1286_v4 = vadd.f32 %v4170_v23, %v4961_v45  ;;  %v4306_v16 = vpop.f32.mrf.mxu1  ;;  %v4965_v23 = vld [vmem:[#allocation8_spill] sm:$0xff] }
 0x195   : > { %4962 = vst [vmem:[#allocation13_spill] sm:$0xff] %v4302_v38  ;;  %v2508_v10 = vadd.f32 %v2507_v6, %v2506_v0  ;;  %4963 = vst [vmem:[#allocation14_spill] sm:$0xff] %v4306_v16  ;;  %v1806_v49 = vmax.f32 %v1213_v36, 0.0  ;;  %v1215_v63 = vadd.f32 %v4176_v52, %v4961_v45  ;;  %v1288_v39 = vadd.f32 %v4186_v55, %v4961_v45 }
 0x196   : > { %v2495_v43 = vadd.f32 %v2494_v26, %v2493_v34  ;;  %v4312_v20 = vpop.f32.mrf.mxu0  ;;  %v2484_v21 = vadd.f32 %v2483_v41, %v2482_v46  ;;  %v2521_v35 = vadd.f32 %v2520_v25, %v2519_v57  ;;  %v1808_v0 = vmax.f32 %v1286_v4, 0.0  ;;  %v4314_v6 = vpop.f32.mrf.mxu1 }
 0x197   : > { %v2509_v61 = vrot.slane %v2508_v10, 2  ;;  %4964 = vst [vmem:[#allocation15_spill] sm:$0xff] %v4314_v6  ;;  %v2110_v11 = vmul.f32 %v4965_v23, %v1806_v49  ;;  %v1807_v16 = vmax.f32 %v1215_v63, 0.0  ;;  %v1809_v34 = vmax.f32 %v1288_v39, 0.0 }
 0x198   : > { %v2496_v38 = vrot.slane %v2495_v43, 2  ;;  %v4317_v36 = vpop.f32.mrf.mxu0  ;;  %v2485_v26 = vrot.slane %v2484_v21, 1  ;;  %v2522_v2 = vrot.slane %v2521_v35, 2  ;;  %v2080_v55 = vmul.f32 %v3643_v60, %v1776_v40  ;;  %v4320_v45 = vpop.f32.mrf.mxu1 }
 0x199   : > { %4966 = vst [vmem:[#allocation16_spill] sm:$0xff] %v4317_v36  ;;  %v2510_v52 = vadd.f32 %v2509_v61, %v2508_v10  ;;  %v2079_v57 = vmul.f32 %v3643_v60, %v1775_v58  ;;  %v2081_v41 = vmul.f32 %v3643_v60, %v1777_v54  ;;  %v2112_v25 = vmul.f32 %v4965_v23, %v1808_v0 }
 0x19a   : > { %v2497_v46 = vadd.f32 %v2496_v38, %v2495_v43  ;;  %v4325_v4 = vpop.f32.mrf.mxu0  ;;  %v2486_v49 = vadd.f32 %v2485_v26, %v2484_v21  ;;  %v2523_v39 = vadd.f32 %v2522_v2, %v2521_v35  ;;  %v2526_v36 = vadd.f32 %v2110_v11, %v2078_v29  ;;  %v4327_v6 = vpop.f32.mrf.mxu1  ;;  %v4967_v38 = vld [vmem:[#allocation5_spill] sm:$0xff] }
 0x19b   : > { %v2511_v63 = vrot.slane %v2510_v52, 1  ;;  %v2111_v40 = vmul.f32 %v4965_v23, %v1807_v16  ;;  %v2113_v61 = vmul.f32 %v4965_v23, %v1809_v34  ;;  %v1219_v58 = vadd.f32 %v4191_v37, %v4967_v38 }
 0x19c   : > { %v2498_v10 = vrot.slane %v2497_v46, 1  ;;  %v4333_v43 = vpop.f32.mrf.mxu0  ;;  %v2748_v54 = vadd.f32 %v3667_v27, %v2486_v49  ;;  %v2524_v60 = vrot.slane %v2523_v39, 1  ;;  %v1292_v2 = vadd.f32 %v4195_v15, %v4967_v38  ;;  %v4338_v29 = vpop.f32.mrf.mxu1 }
 0x19d   : > { %v2512_v0 = vadd.f32 %v2511_v63, %v2510_v52  ;;  %v1838_v21 = vmax.f32 %v1219_v58, 0.0  ;;  %v1221_v16 = vadd.f32 %v4202_v3, %v4967_v38  ;;  %v1294_v35 = vadd.f32 %v4209_v1, %v4967_v38 }
 0x19e   : > { %v2499_v11 = vadd.f32 %v2498_v10, %v2497_v46  ;;  %v4344_v37 = vpop.f32.mrf.mxu0  ;;  %v2525_v26 = vadd.f32 %v2524_v60, %v2523_v39  ;;  %v1840_v52 = vmax.f32 %v1292_v2, 0.0  ;;  %v1223_v49 = vadd.f32 %v4212_v5, %v3637_v56  ;;  %v4349_v15 = vpop.f32.mrf.mxu1 }
 0x19f   : > { %4968 = vst [vmem:[#allocation17_spill] sm:$0xff] %v4344_v37  ;;  %v2750_v34 = vadd.f32 %v3667_v27, %v2512_v0  ;;  %4969 = vst [vmem:[#allocation18_spill] sm:$0xff] %v4349_v15  ;;  %v2142_v63 = vmul.f32 %v3661_v17, %v1838_v21  ;;  %v1839_v10 = vmax.f32 %v1221_v16, 0.0  ;;  %v1841_v3 = vmax.f32 %v1294_v35, 0.0 }
 0x1a0   : > { %v2749_v46 = vadd.f32 %v3667_v27, %v2499_v11  ;;  %v4353_v58 = vpop.f32.mrf.mxu0  ;;  %v2751_v1 = vadd.f32 %v3667_v27, %v2525_v26  ;;  %v2144_v37 = vmul.f32 %v3661_v17, %v1840_v52  ;;  %v1870_v0 = vmax.f32 %v1223_v49, 0.0  ;;  %v4359_v39 = vpop.f32.mrf.mxu1 }
 0x1a1   : > { %4970 = vst [vmem:[#allocation19_spill] sm:$0xff] %v4353_v58  ;;  %v1296_v60 = vadd.f32 %v4217_v62, %v3637_v56  ;;  %v2552_v2 = vadd.f32 %v2112_v25, %v2080_v55  ;;  %v2539_v15 = vadd.f32 %v2111_v40, %v2079_v57  ;;  %v2143_v11 = vmul.f32 %v3661_v17, %v1839_v10 }
 0x1a2   : > { %v2851_v5 = vcombine.low %v2748_v54, %v2749_v46  ;;  %v4362_v21 = vpop.f32.mrf.mxu0  ;;  %v2852_v16 = vcombine.low %v2750_v34, %v2751_v1  ;;  %v2565_v35 = vadd.f32 %v2113_v61, %v2081_v41  ;;  %v2527_v58 = vadd.f32 %v2526_v36, %v2142_v63  ;;  %v4364_v26 = vpop.f32.mrf.mxu1 }
 0x1a3   : > { %v1872_v38 = vmax.f32 %v1296_v60, 0.0  ;;  %v2553_v49 = vadd.f32 %v2552_v2, %v2144_v37  ;;  %v2145_v62 = vmul.f32 %v3661_v17, %v1841_v3  ;;  %v1225_v54 = vadd.f32 %v4223_v32, %v3637_v56 }
 0x1a4   : > { %v2873_v52 = vrot.slane %v2851_v5, %v3669_v28  ;;  %v4370_v55 = vpop.f32.mrf.mxu0  ;;  %v2880_v57 = vrot.slane %v2852_v16, %v3669_v28  ;;  %v2540_v25 = vadd.f32 %v2539_v15, %v2143_v11  ;;  %v2174_v40 = vmul.f32 %v3686_v44, %v1870_v0  ;;  %v4376_v41 = vpop.f32.mrf.mxu1 }
 0x1a5   : > { %v1298_v36 = vadd.f32 %v4228_v50, %v3637_v56  ;;  %v1871_v61 = vmax.f32 %v1225_v54, 0.0  ;;  %v1229_v37 = vadd.f32 %v4232_v47, %v3656_v8  ;;  %v1302_v34 = vadd.f32 %v4237_v59, %v3656_v8 }
 0x1a6   : > { %v1231_v32 = vadd.f32 %v4244_v30, %v3656_v8  ;;  %v4384_v46 = vpop.f32.mrf.mxu0  ;;  %v2882_v15 = vcombine.low %v2873_v52, %v2880_v57  ;;  %v2176_v63 = vmul.f32 %v3686_v44, %v1872_v38  ;;  %v1304_v50 = vadd.f32 %v4249_v13, %v3656_v8  ;;  %v4389_v3 = vpop.f32.mrf.mxu1 }
 0x1a7   : > { %v1873_v10 = vmax.f32 %v1298_v36, 0.0  ;;  %v2175_v1 = vmul.f32 %v3686_v44, %v1871_v61  ;;  %v1902_v47 = vmax.f32 %v1229_v37, 0.0  ;;  %v1904_v0 = vmax.f32 %v1302_v34, 0.0 }
 0x1a8   : > { %v1903_v60 = vmax.f32 %v1231_v32, 0.0  ;;  %v4392_v59 = vpop.f32.mrf.mxu0  ;;  %v2896_v30 = vrot.slane %v2882_v15, %v3669_v28  ;;  %v1905_v2 = vmax.f32 %v1304_v50, 0.0  ;;  %v1233_v38 = vadd.f32 %v4252_v42, %v3674_v33  ;;  %v4398_v11 = vpop.f32.mrf.mxu1 }
 0x1a9   : > { %v2177_v5 = vmul.f32 %v3686_v44, %v1873_v10  ;;  %v2566_v13 = vadd.f32 %v2565_v35, %v2145_v62  ;;  %v2528_v16 = vadd.f32 %v2527_v58, %v2174_v40  ;;  %v2206_v52 = vmul.f32 %v3705_v24, %v1902_v47 }
 0x1aa   : > { %v4401_v54 = vpop.f32.mrf.mxu0  ;;  %v2897_v57 = vcombine.low %v4293_v22, %v2896_v30  ;;  %v2554_v36 = vadd.f32 %v2553_v49, %v2176_v63  ;;  %v2541_v61 = vadd.f32 %v2540_v25, %v2175_v1  ;;  %v1934_v37 = vmax.f32 %v1233_v38, 0.0  ;;  %v4404_v34 = vpop.f32.mrf.mxu1 }
 0x1ab   : > { %v2567_v32 = vadd.f32 %v2566_v13, %v2177_v5  ;;  %v2208_v15 = vmul.f32 %v3705_v24, %v1904_v0  ;;  %v2207_v42 = vmul.f32 %v3705_v24, %v1903_v60  ;;  %v1306_v35 = vadd.f32 %v4257_v19, %v3674_v33 }
 0x1ac   : > { %v4410_v58 = vpop.f32.mrf.mxu0  ;;  %3001 = vst [vmem:[%s3983_s13 + $0x8] sm:$0xff] %v2897_v57  ;;  %v2529_v62 = vadd.f32 %v2528_v16, %v2206_v52  ;;  %v2209_v40 = vmul.f32 %v3705_v24, %v1905_v2  ;;  %v1235_v22 = vadd.f32 %v4262_v48, %v3674_v33  ;;  %v1308_v49 = vadd.f32 %v4268_v53, %v3674_v33  ;;  %v4418_v25 = vpop.f32.mrf.mxu1  ;;  %v4971_v16 = vld [vmem:[#allocation11_spill] sm:$0xff] }
 0x1ad   : > { %v1936_v63 = vmax.f32 %v1306_v35, 0.0  ;;  %v1239_v10 = vadd.f32 %v4272_v9, %v3697_v12  ;;  %v1312_v19 = vadd.f32 %v4277_v18, %v3697_v12  ;;  %v1241_v50 = vadd.f32 %v4284_v31, %v3697_v12 }
 0x1ae   : > { %v4426_v1 = vpop.f32.mrf.mxu0  ;;  %v2238_v47 = vmul.f32 %v3725_v7, %v1934_v37  ;;  %v1935_v48 = vmax.f32 %v1235_v22, 0.0  ;;  %v1937_v0 = vmax.f32 %v1308_v49, 0.0  ;;  %v1314_v53 = vadd.f32 %v4287_v14, %v3697_v12  ;;  %v4431_v60 = vpop.f32.mrf.mxu1  ;;  %v4972_v22 = vld [vmem:[#allocation9_spill] sm:$0xff] }
 0x1af   : > { %v2240_v30 = vmul.f32 %v3725_v7, %v1936_v63  ;;  %v1966_v9 = vmax.f32 %v1239_v10, 0.0  ;;  %v1968_v5 = vmax.f32 %v1312_v19, 0.0  ;;  %v1967_v2 = vmax.f32 %v1241_v50, 0.0 }
 0x1b0   : > { %v4434_v18 = vpop.f32.mrf.mxu0  ;;  %v2555_v38 = vadd.f32 %v2554_v36, %v2208_v15  ;;  %v2239_v31 = vmul.f32 %v3725_v7, %v1935_v48  ;;  %v1969_v13 = vmax.f32 %v1314_v53, 0.0  ;;  %v1243_v52 = vadd.f32 %v4971_v16, %v3719_v51  ;;  %v4439_v57 = vpop.f32.mrf.mxu1  ;;  %v4975_v16 = vld [vmem:[#allocation12_spill] sm:$0xff] }
 0x1b1   : > { %v2542_v37 = vadd.f32 %v2541_v61, %v2207_v42  ;;  %v2568_v14 = vadd.f32 %v2567_v32, %v2209_v40  ;;  %v2241_v35 = vmul.f32 %v3725_v7, %v1937_v0  ;;  %v2270_v49 = vmul.f32 %v4972_v22, %v1966_v9  ;;  %v4976_v32 = vld [vmem:[#allocation13_spill] sm:$0xff]  ;;  %v4979_v9 = vld [vmem:[#allocation14_spill] sm:$0xff] }
 0x1b2   : > { %v4443_v63 = vpop.f32.mrf.mxu0  ;;  %v2530_v10 = vadd.f32 %v2529_v62, %v2238_v47  ;;  %v2556_v19 = vadd.f32 %v2555_v38, %v2240_v30  ;;  %v2272_v36 = vmul.f32 %v4972_v22, %v1968_v5  ;;  %v1998_v15 = vmax.f32 %v1243_v52, 0.0  ;;  %v4446_v50 = vpop.f32.mrf.mxu1  ;;  %v4978_v47 = vld [vmem:[#allocation10_spill] sm:$0xff] }
 0x1b3   : > { %4973 = vst [vmem:[#allocation11_spill] sm:$0xff] %v4443_v63  ;;  %4974 = vst [vmem:[#allocation9_spill] sm:$0xff] %v4446_v50  ;;  %v2543_v48 = vadd.f32 %v2542_v37, %v2239_v31  ;;  %v2271_v53 = vmul.f32 %v4972_v22, %v1967_v2  ;;  %v1316_v61 = vadd.f32 %v4975_v16, %v3719_v51  ;;  %v4981_v37 = vld [vmem:[#allocation4_spill] sm:$0xff] }
 0x1b4   : > { %v1245_v42 = vadd.f32 %v4976_v32, %v3719_v51  ;;  %v4453_v40 = vpop.f32.mrf.mxu0  ;;  %v2531_v0 = vadd.f32 %v2530_v10, %v2270_v49  ;;  %v2273_v62 = vmul.f32 %v4972_v22, %v1969_v13  ;;  %v2302_v30 = vmul.f32 %v4978_v47, %v1998_v15  ;;  %v4459_v38 = vpop.f32.mrf.mxu1  ;;  %v4983_v49 = vld [vmem:[#allocation15_spill] sm:$0xff]  ;;  %v4984_v10 = vld [vmem:[#allocation16_spill] sm:$0xff] }
 0x1b5   : > { %4977 = vst [vmem:[#allocation12_spill] sm:$0xff] %v4453_v40  ;;  %v1318_v5 = vadd.f32 %v4979_v9, %v3719_v51  ;;  %4980 = vst [vmem:[#allocation13_spill] sm:$0xff] %v4459_v38  ;;  %v2569_v31 = vadd.f32 %v2568_v14, %v2241_v35  ;;  %v2000_v2 = vmax.f32 %v1316_v61, 0.0  ;;  %v1355_v16 = vadd.f32 %v4312_v20, %v4981_v37 }
 0x1b6   : > { %v1999_v52 = vmax.f32 %v1245_v42, 0.0  ;;  %v4463_v50 = vpop.f32.mrf.mxu0  ;;  %v2532_v32 = vadd.f32 %v2531_v0, %v2302_v30  ;;  %v1428_v13 = vadd.f32 %v4983_v49, %v4981_v37  ;;  %v1357_v15 = vadd.f32 %v4984_v10, %v4981_v37  ;;  %v4469_v63 = vpop.f32.mrf.mxu1 }
 0x1b7   : > { %4982 = vst [vmem:[#allocation14_spill] sm:$0xff] %v4463_v50  ;;  %v2001_v40 = vmax.f32 %v1318_v5, 0.0  ;;  %4985 = vst [vmem:[#allocation15_spill] sm:$0xff] %v4469_v63  ;;  %v2557_v9 = vadd.f32 %v2556_v19, %v2272_v36  ;;  %v2544_v38 = vadd.f32 %v2543_v48, %v2271_v53  ;;  %v2304_v14 = vmul.f32 %v4978_v47, %v2000_v2 }
 0x1b8   : > { %v2303_v35 = vmul.f32 %v4978_v47, %v1999_v52  ;;  %v4473_v61 = vpop.f32.mrf.mxu0  ;;  %v2570_v20 = vadd.f32 %v2569_v31, %v2273_v62  ;;  %v2533_v42 = vrot.slane %v2532_v32, 4  ;;  %v4476_v30 = vpop.f32.mrf.mxu1  ;;  %v1778_v50 = vmax.f32 %v1355_v16, 0.0 }
 0x1b9   : > { %4986 = vst [vmem:[#allocation16_spill] sm:$0xff] %v4473_v61  ;;  %v2305_v0 = vmul.f32 %v4978_v47, %v2001_v40  ;;  %4987 = vst [vmem:[#allocation20_spill] sm:$0xff] %v4476_v30  ;;  %v2558_v5 = vadd.f32 %v2557_v9, %v2304_v14  ;;  %v1430_v10 = vadd.f32 %v4320_v45, %v4981_v37  ;;  %v1780_v53 = vmax.f32 %v1428_v13, 0.0  ;;  %v4990_v61 = vld [vmem:[#allocation6_spill] sm:$0xff] }
 0x1ba   : > { %v2545_v49 = vadd.f32 %v2544_v38, %v2303_v35  ;;  %v4480_v19 = vpop.f32.mrf.mxu0  ;;  %v2534_v36 = vadd.f32 %v2533_v42, %v2532_v32  ;;  %v1779_v2 = vmax.f32 %v1357_v15, 0.0  ;;  %v4482_v52 = vpop.f32.mrf.mxu1  ;;  %v1359_v40 = vadd.f32 %v4325_v4, %v4990_v61 }
 0x1bb   : > { %4988 = vst [vmem:[#allocation21_spill] sm:$0xff] %v4480_v19  ;;  %v2571_v48 = vadd.f32 %v2570_v20, %v2305_v0  ;;  %4989 = vst [vmem:[#allocation22_spill] sm:$0xff] %v4482_v52  ;;  %v2559_v62 = vrot.slane %v2558_v5, 4  ;;  %v1432_v38 = vadd.f32 %v4327_v6, %v4990_v61  ;;  %v1361_v32 = vadd.f32 %v4333_v43, %v4990_v61  ;;  %v4995_v43 = vld [vmem:[#allocation7_spill] sm:$0xff] }
 0x1bc   : > { %v2546_v31 = vrot.slane %v2545_v49, 4  ;;  %v4488_v16 = vpop.f32.mrf.mxu0  ;;  %v2535_v9 = vrot.slane %v2534_v36, 2  ;;  %v1434_v13 = vadd.f32 %v4338_v29, %v4990_v61  ;;  %v4494_v15 = vpop.f32.mrf.mxu1  ;;  %v1781_v20 = vmax.f32 %v1430_v10, 0.0 }
 0x1bd   : > { %4991 = vst [vmem:[#allocation23_spill] sm:$0xff] %v4488_v16  ;;  %v2572_v45 = vrot.slane %v2571_v48, 4  ;;  %4992 = vst [vmem:[#allocation24_spill] sm:$0xff] %v4494_v15  ;;  %v2560_v14 = vadd.f32 %v2559_v62, %v2558_v5  ;;  %v1810_v42 = vmax.f32 %v1359_v40, 0.0  ;;  %v1812_v52 = vmax.f32 %v1432_v38, 0.0 }
 0x1be   : > { %v2547_v35 = vadd.f32 %v2546_v31, %v2545_v49  ;;  %v4496_v4 = vpop.f32.mrf.mxu0  ;;  %v2536_v0 = vadd.f32 %v2535_v9, %v2534_v36  ;;  %v1811_v16 = vmax.f32 %v1361_v32, 0.0  ;;  %v4498_v19 = vpop.f32.mrf.mxu1  ;;  %v2082_v47 = vmul.f32 %v4995_v43, %v1778_v50 }
 0x1bf   : > { %4993 = vst [vmem:[#allocation25_spill] sm:$0xff] %v4496_v4  ;;  %v2573_v6 = vadd.f32 %v2572_v45, %v2571_v48  ;;  %4994 = vst [vmem:[#allocation26_spill] sm:$0xff] %v4498_v19  ;;  %v2561_v30 = vrot.slane %v2560_v14, 2  ;;  %v2084_v29 = vmul.f32 %v4995_v43, %v1780_v53  ;;  %v2083_v10 = vmul.f32 %v4995_v43, %v1779_v2  ;;  %v4999_v2 = vld [vmem:[#allocation5_spill] sm:$0xff] }
 0x1c0   : > { %v2548_v63 = vrot.slane %v2547_v35, 2  ;;  %v4502_v61 = vpop.f32.mrf.mxu0  ;;  %v2537_v5 = vrot.slane %v2536_v0, 1  ;;  %v1813_v62 = vmax.f32 %v1434_v13, 0.0  ;;  %v4505_v31 = vpop.f32.mrf.mxu1  ;;  %v2085_v40 = vmul.f32 %v4995_v43, %v1781_v20  ;;  %v5000_v13 = vld [vmem:[#allocation17_spill] sm:$0xff] }
 0x1c1   : > { %4996 = vst [vmem:[#allocation27_spill] sm:$0xff] %v4502_v61  ;;  %v2574_v49 = vrot.slane %v2573_v6, 2  ;;  %4997 = vst [vmem:[#allocation28_spill] sm:$0xff] %v4505_v31  ;;  %v2562_v36 = vadd.f32 %v2561_v30, %v2560_v14  ;;  %v2114_v38 = vmul.f32 %v4965_v23, %v1810_v42  ;;  %v2116_v50 = vmul.f32 %v4965_v23, %v1812_v52  ;;  %v5001_v30 = vld [vmem:[#allocation18_spill] sm:$0xff]  ;;  %v5003_v42 = vld [vmem:[#allocation19_spill] sm:$0xff] }
 0x1c2   : > { %v2549_v48 = vadd.f32 %v2548_v63, %v2547_v35  ;;  %v2538_v9 = vadd.f32 %v2537_v5, %v2536_v0  ;;  %v2115_v53 = vmul.f32 %v4965_v23, %v1811_v16  ;;  %v4511_v32 = vpop.f32.mrf.mxu0  ;;  %v1365_v4 = vadd.f32 %v5000_v13, %v4999_v2  ;;  %v4517_v14 = vpop.f32.mrf.mxu1 }
 0x1c3   : > { %v2575_v45 = vadd.f32 %v2574_v49, %v2573_v6  ;;  %4998 = vst [vmem:[#allocation29_spill] sm:$0xff] %v4511_v32  ;;  %v2563_v61 = vrot.slane %v2562_v36, 1  ;;  %v1438_v63 = vadd.f32 %v5001_v30, %v4999_v2  ;;  %5002 = vst [vmem:[#allocation5_spill] sm:$0xff] %v4517_v14  ;;  %v2117_v20 = vmul.f32 %v4965_v23, %v1813_v62 }
 0x1c4   : > { %v2550_v19 = vrot.slane %v2549_v48, 1  ;;  %v1367_v52 = vadd.f32 %v5003_v42, %v4999_v2  ;;  %v1440_v16 = vadd.f32 %v4359_v39, %v4999_v2  ;;  %v1842_v5 = vmax.f32 %v1365_v4, 0.0  ;;  %v4526_v14 = vpop.f32.mrf.mxu0  ;;  %v4530_v15 = vpop.f32.mrf.mxu1 }
 0x1c5   : > { %v2576_v35 = vrot.slane %v2575_v45, 1  ;;  %v2564_v0 = vadd.f32 %v2563_v61, %v2562_v36  ;;  %v1844_v49 = vmax.f32 %v1438_v63, 0.0  ;;  %v1369_v30 = vadd.f32 %v4362_v21, %v3637_v56 }
 0x1c6   : > { %v2551_v6 = vadd.f32 %v2550_v19, %v2549_v48  ;;  %v1843_v13 = vmax.f32 %v1367_v52, 0.0  ;;  %v1845_v31 = vmax.f32 %v1440_v16, 0.0  ;;  %v2752_v62 = vadd.f32 %v3667_v27, %v2538_v9 }
 0x1c7   : > { %v2577_v32 = vadd.f32 %v2576_v35, %v2575_v45  ;;  %v2578_v42 = vadd.f32 %v2114_v38, %v2082_v47  ;;  %v2604_v43 = vadd.f32 %v2116_v50, %v2084_v29  ;;  %v2754_v39 = vadd.f32 %v3667_v27, %v2564_v0  ;;  %v4540_v38 = vpop.f32.mrf.mxu0 }
 0x1c8   : > { %v2753_v23 = vadd.f32 %v3667_v27, %v2551_v6  ;;  %v2591_v19 = vadd.f32 %v2115_v53, %v2083_v10  ;;  %v1874_v4 = vmax.f32 %v1369_v30, 0.0  ;;  %v2617_v48 = vadd.f32 %v2117_v20, %v2085_v40  ;;  %v4547_v53 = vpop.f32.mrf.mxu1 }
 0x1c9   : > { %v2755_v61 = vadd.f32 %v3667_v27, %v2577_v32  ;;  %v2146_v21 = vmul.f32 %v3661_v17, %v1842_v5  ;;  %v1442_v45 = vadd.f32 %v4364_v26, %v3637_v56  ;;  %v2148_v63 = vmul.f32 %v3661_v17, %v1844_v49  ;;  %v4564_v49 = vpop.f32.mrf.mxu0 }
 0x1ca   : > { %v2898_v36 = vcombine.low %v2752_v62, %v2753_v23  ;;  %v2147_v47 = vmul.f32 %v3661_v17, %v1843_v13  ;;  %v2149_v29 = vmul.f32 %v3661_v17, %v1845_v31  ;;  %v2178_v50 = vmul.f32 %v3686_v44, %v1874_v4  ;;  %v4568_v62 = vpop.f32.mrf.mxu1 }
 0x1cb   : > { %v2899_v9 = vcombine.low %v2754_v39, %v2755_v61  ;;  %v1876_v10 = vmax.f32 %v1442_v45, 0.0  ;;  %v1371_v23 = vadd.f32 %v4370_v55, %v3637_v56  ;;  %v1444_v40 = vadd.f32 %v4376_v41, %v3637_v56 }
 0x1cc   : > { %v4550_v26 = vrot.slane %v2898_v36, %v3669_v28  ;;  %v1375_v31 = vadd.f32 %v4384_v46, %v3656_v8  ;;  %v1448_v35 = vadd.f32 %v4389_v3, %v3656_v8  ;;  %v1377_v41 = vadd.f32 %v4392_v59, %v3656_v8 }
 0x1cd   : > { %v4553_v32 = vrot.slane %v2899_v9, %v3669_v28  ;;  %v2180_v20 = vmul.f32 %v3686_v44, %v1876_v10  ;;  %v1875_v55 = vmax.f32 %v1371_v23, 0.0  ;;  %v1877_v52 = vmax.f32 %v1444_v40, 0.0  ;;  %v4585_v10 = vpop.f32.mrf.mxu1 }
 0x1ce   : > { %v2579_v16 = vadd.f32 %v2578_v42, %v2146_v21  ;;  %v1906_v0 = vmax.f32 %v1375_v31, 0.0  ;;  %v1908_v6 = vmax.f32 %v1448_v35, 0.0  ;;  %v1450_v5 = vadd.f32 %v4398_v11, %v3656_v8 }
 0x1cf   : > { %v2605_v13 = vadd.f32 %v2604_v43, %v2148_v63  ;;  %v2179_v46 = vmul.f32 %v3686_v44, %v1875_v55  ;;  %v2181_v3 = vmul.f32 %v3686_v44, %v1877_v52  ;;  %v1907_v30 = vmax.f32 %v1377_v41, 0.0 }
 0x1d0   : > { %v2592_v39 = vadd.f32 %v2591_v19, %v2147_v47  ;;  %v2618_v61 = vadd.f32 %v2617_v48, %v2149_v29  ;;  %v2580_v4 = vadd.f32 %v2579_v16, %v2178_v50  ;;  %v1909_v59 = vmax.f32 %v1450_v5, 0.0  ;;  %v4578_v19 = vpop.f32.mrf.mxu0  ;;  %v4601_v5 = vpop.f32.mrf.mxu1 }
 0x1d1   : > { %v2930_v42 = vcombine.low %v4550_v26, %v4553_v32  ;;  %v2606_v36 = vadd.f32 %v2605_v13, %v2180_v20  ;;  %v2210_v11 = vmul.f32 %v3705_v24, %v1906_v0  ;;  %v1379_v43 = vadd.f32 %v4401_v54, %v3674_v33 }
 0x1d2   : > { %v2593_v21 = vadd.f32 %v2592_v39, %v2179_v46  ;;  %v2619_v45 = vadd.f32 %v2618_v61, %v2181_v3  ;;  %v2212_v9 = vmul.f32 %v3705_v24, %v1908_v6  ;;  %v1452_v63 = vadd.f32 %v4404_v34, %v3674_v33  ;;  %v4598_v16 = vpop.f32.mrf.mxu0 }
 0x1d3   : > { %v2211_v48 = vmul.f32 %v3705_v24, %v1907_v30  ;;  %v1938_v47 = vmax.f32 %v1379_v43, 0.0  ;;  %v1381_v29 = vadd.f32 %v4410_v58, %v3674_v33  ;;  %v1454_v50 = vadd.f32 %v4418_v25, %v3674_v33 }
 0x1d4   : > { %v2213_v54 = vmul.f32 %v3705_v24, %v1909_v59  ;;  %v1940_v23 = vmax.f32 %v1452_v63, 0.0  ;;  %v1385_v40 = vadd.f32 %v4426_v1, %v3697_v12  ;;  %v1458_v34 = vadd.f32 %v4431_v60, %v3697_v12 }
 0x1d5   : > { %v2242_v31 = vmul.f32 %v3725_v7, %v1938_v47  ;;  %v1939_v35 = vmax.f32 %v1381_v29, 0.0  ;;  %v1941_v20 = vmax.f32 %v1454_v50, 0.0  ;;  %v1387_v58 = vadd.f32 %v4434_v18, %v3697_v12  ;;  %v5007_v29 = vld [vmem:[#allocation13_spill] sm:$0xff] }
 0x1d6   : > { %v2244_v25 = vmul.f32 %v3725_v7, %v1940_v23  ;;  %v1970_v55 = vmax.f32 %v1385_v40, 0.0  ;;  %v1972_v52 = vmax.f32 %v1458_v34, 0.0  ;;  %v1460_v41 = vadd.f32 %v4439_v57, %v3697_v12  ;;  %v5004_v57 = vld [vmem:[#allocation11_spill] sm:$0xff] }
 0x1d7   : > { %v2581_v1 = vadd.f32 %v2580_v4, %v2210_v11  ;;  %v2607_v0 = vadd.f32 %v2606_v36, %v2212_v9  ;;  %v2243_v60 = vmul.f32 %v3725_v7, %v1939_v35  ;;  %v1971_v6 = vmax.f32 %v1387_v58, 0.0  ;;  %v5005_v11 = vld [vmem:[#allocation9_spill] sm:$0xff] }
 0x1d8   : > { %v2594_v13 = vadd.f32 %v2593_v21, %v2211_v48  ;;  %v2245_v46 = vmul.f32 %v3725_v7, %v1941_v20  ;;  %v2274_v18 = vmul.f32 %v4972_v22, %v1970_v55  ;;  %v1973_v3 = vmax.f32 %v1460_v41, 0.0  ;;  %v4611_v21 = vpop.f32.mrf.mxu0  ;;  %v5009_v20 = vld [vmem:[#allocation10_spill] sm:$0xff] }
 0x1d9   : > { %v2620_v30 = vadd.f32 %v2619_v45, %v2213_v54  ;;  %v2582_v39 = vadd.f32 %v2581_v1, %v2242_v31  ;;  %v2608_v61 = vadd.f32 %v2607_v0, %v2244_v25  ;;  %v1389_v59 = vadd.f32 %v5004_v57, %v3719_v51  ;;  %v5006_v45 = vld [vmem:[#allocation12_spill] sm:$0xff]  ;;  %v4618_v54 = vpop.f32.mrf.mxu1  ;;  %v5008_v31 = vld [vmem:[#allocation14_spill] sm:$0xff] }
 0x1da   : > { %v2595_v43 = vadd.f32 %v2594_v13, %v2243_v60  ;;  %v2276_v4 = vmul.f32 %v4972_v22, %v1972_v52  ;;  %v2275_v36 = vmul.f32 %v4972_v22, %v1971_v6  ;;  %v1462_v9 = vadd.f32 %v5005_v11, %v3719_v51  ;;  %v5010_v52 = vld [vmem:[#allocation15_spill] sm:$0xff]  ;;  %v5011_v6 = vld [vmem:[#allocation16_spill] sm:$0xff] }
 0x1db   : > { %v2277_v63 = vmul.f32 %v4972_v22, %v1973_v3  ;;  %v2002_v48 = vmax.f32 %v1389_v59, 0.0  ;;  %v1391_v47 = vadd.f32 %v5006_v45, %v3719_v51  ;;  %v1464_v50 = vadd.f32 %v5007_v29, %v3719_v51  ;;  %v4632_v57 = vpop.f32.mrf.mxu1  ;;  %v5013_v29 = vld [vmem:[#allocation6_spill] sm:$0xff] }
 0x1dc   : > { %v2621_v23 = vadd.f32 %v2620_v30, %v2245_v46  ;;  %v2583_v40 = vadd.f32 %v2582_v39, %v2274_v18  ;;  %v2004_v34 = vmax.f32 %v1462_v9, 0.0  ;;  %v1501_v35 = vadd.f32 %v5008_v31, %v4981_v37  ;;  %v4628_v46 = vpop.f32.mrf.mxu0 }
 0x1dd   : > { %v2306_v58 = vmul.f32 %v5009_v20, %v2002_v48  ;;  %v2003_v25 = vmax.f32 %v1391_v47, 0.0  ;;  %v2005_v55 = vmax.f32 %v1464_v50, 0.0  ;;  %v1574_v41 = vadd.f32 %v5010_v52, %v4981_v37  ;;  %v5014_v50 = vld [vmem:[#allocation21_spill] sm:$0xff] }
 0x1de   : > { %v2609_v1 = vadd.f32 %v2608_v61, %v2276_v4  ;;  %v2596_v0 = vadd.f32 %v2595_v43, %v2275_v36  ;;  %v2308_v60 = vmul.f32 %v5009_v20, %v2004_v34  ;;  %v1503_v13 = vadd.f32 %v5011_v6, %v4981_v37  ;;  %v5012_v4 = vld [vmem:[#allocation20_spill] sm:$0xff]  ;;  %v4646_v26 = vpop.f32.mrf.mxu0 }
 0x1df   : > { %v2622_v18 = vadd.f32 %v2621_v23, %v2277_v63  ;;  %v2584_v3 = vadd.f32 %v2583_v40, %v2306_v58  ;;  %v2307_v30 = vmul.f32 %v5009_v20, %v2003_v25  ;;  %v2309_v39 = vmul.f32 %v5009_v20, %v2005_v55  ;;  %v5015_v40 = vld [vmem:[#allocation22_spill] sm:$0xff]  ;;  %v4650_v25 = vpop.f32.mrf.mxu1 }
 0x1e0   : > { %v4638_v61 = vrot.slane %v2930_v42, %v3669_v28  ;;  %v2610_v59 = vadd.f32 %v2609_v1, %v2308_v60  ;;  %v1782_v43 = vmax.f32 %v1501_v35, 0.0  ;;  %v1576_v36 = vadd.f32 %v5012_v4, %v4981_v37  ;;  %v5016_v35 = vld [vmem:[#allocation23_spill] sm:$0xff]  ;;  %v5017_v1 = vld [vmem:[#allocation24_spill] sm:$0xff] }
 0x1e1   : > { %v2585_v11 = vrot.slane %v2584_v3, 4  ;;  %v2597_v9 = vadd.f32 %v2596_v0, %v2307_v30  ;;  %v2623_v63 = vadd.f32 %v2622_v18, %v2309_v39  ;;  %v1784_v48 = vmax.f32 %v1574_v41, 0.0  ;;  %v5018_v39 = vld [vmem:[#allocation7_spill] sm:$0xff] }
 0x1e2   : > { %v2611_v45 = vrot.slane %v2610_v59, 4  ;;  %v1783_v47 = vmax.f32 %v1503_v13, 0.0  ;;  %v1505_v23 = vadd.f32 %v5014_v50, %v5013_v29  ;;  %v1578_v34 = vadd.f32 %v5015_v40, %v5013_v29  ;;  %v4656_v50 = vpop.f32.mrf.mxu0 }
 0x1e3   : > { %v2586_v32 = vadd.f32 %v2585_v11, %v2584_v3  ;;  %v2598_v42 = vrot.slane %v2597_v9, 4  ;;  %v2624_v31 = vrot.slane %v2623_v63, 4  ;;  %v1507_v58 = vadd.f32 %v5016_v35, %v5013_v29  ;;  %5019 = vst [vmem:[#allocation17_spill] sm:$0xff] %v4656_v50 }
 0x1e4   : > { %v2612_v55 = vadd.f32 %v2611_v45, %v2610_v59  ;;  %v1785_v52 = vmax.f32 %v1576_v36, 0.0  ;;  %v1814_v41 = vmax.f32 %v1505_v23, 0.0  ;;  %v1580_v0 = vadd.f32 %v5017_v1, %v5013_v29  ;;  %v4659_v45 = vpop.f32.mrf.mxu1 }
 0x1e5   : > { %v2587_v60 = vrot.slane %v2586_v32, 2  ;;  %v2599_v6 = vadd.f32 %v2598_v42, %v2597_v9  ;;  %v2625_v13 = vadd.f32 %v2624_v31, %v2623_v63  ;;  %v1816_v18 = vmax.f32 %v1578_v34, 0.0  ;;  %5020 = vst [vmem:[#allocation18_spill] sm:$0xff] %v4659_v45  ;;  %v5021_v63 = vld [vmem:[#allocation8_spill] sm:$0xff] }
 0x1e6   : > { %v2613_v30 = vrot.slane %v2612_v55, 2  ;;  %v2086_v3 = vmul.f32 %v5018_v39, %v1782_v43  ;;  %v2088_v4 = vmul.f32 %v5018_v39, %v1784_v48  ;;  %v1815_v11 = vmax.f32 %v1507_v58, 0.0 }
 0x1e7   : > { %v2588_v40 = vadd.f32 %v2587_v60, %v2586_v32  ;;  %v2600_v35 = vrot.slane %v2599_v6, 2  ;;  %v2626_v59 = vrot.slane %v2625_v13, 2  ;;  %v2087_v36 = vmul.f32 %v5018_v39, %v1783_v47  ;;  %v5022_v60 = vld [vmem:[#allocation25_spill] sm:$0xff]  ;;  %v5023_v47 = vld [vmem:[#allocation26_spill] sm:$0xff] }
 0x1e8   : > { %v2614_v23 = vadd.f32 %v2613_v30, %v2612_v55  ;;  %v2089_v9 = vmul.f32 %v5018_v39, %v1785_v52  ;;  %v2118_v34 = vmul.f32 %v5021_v63, %v1814_v41  ;;  %v1817_v42 = vmax.f32 %v1580_v0, 0.0  ;;  %v4669_v55 = vpop.f32.mrf.mxu0  ;;  %v5025_v0 = vld [vmem:[#allocation27_spill] sm:$0xff] }
 0x1e9   : > { %v2589_v31 = vrot.slane %v2588_v40, 1  ;;  %v2601_v43 = vadd.f32 %v2600_v35, %v2599_v6  ;;  %v2627_v1 = vadd.f32 %v2626_v59, %v2625_v13  ;;  %v2120_v48 = vmul.f32 %v5021_v63, %v1816_v18  ;;  %5024 = vst [vmem:[#allocation19_spill] sm:$0xff] %v4669_v55  ;;  %v4673_v13 = vpop.f32.mrf.mxu1  ;;  %v5026_v59 = vld [vmem:[#allocation28_spill] sm:$0xff] }
 0x1ea   : > { %v2615_v58 = vrot.slane %v2614_v23, 1  ;;  %v2119_v32 = vmul.f32 %v5021_v63, %v1815_v11  ;;  %v1511_v29 = vadd.f32 %v5022_v60, %v4999_v2  ;;  %v1584_v37 = vadd.f32 %v5023_v47, %v4999_v2 }
 0x1eb   : > { %v2590_v52 = vadd.f32 %v2589_v31, %v2588_v40  ;;  %v2602_v30 = vrot.slane %v2601_v43, 1  ;;  %v2628_v41 = vrot.slane %v2627_v1, 1  ;;  %v1513_v6 = vadd.f32 %v5025_v0, %v4999_v2  ;;  %v4680_v0 = vpop.f32.mrf.mxu0 }
 0x1ec   : > { %v2616_v18 = vadd.f32 %v2615_v58, %v2614_v23  ;;  %v2121_v35 = vmul.f32 %v5021_v63, %v1817_v42  ;;  %v1846_v11 = vmax.f32 %v1511_v29, 0.0  ;;  %v1586_v60 = vadd.f32 %v5026_v59, %v4999_v2  ;;  %v5027_v58 = vld [vmem:[#allocation29_spill] sm:$0xff] }
 0x1ed   : > { %v2603_v39 = vadd.f32 %v2602_v30, %v2601_v43  ;;  %v2629_v20 = vadd.f32 %v2628_v41, %v2627_v1  ;;  %v2630_v47 = vadd.f32 %v2118_v34, %v2086_v3  ;;  %v1848_v45 = vmax.f32 %v1584_v37, 0.0  ;;  %v4686_v43 = vpop.f32.mrf.mxu1  ;;  %v5028_v1 = vld [vmem:[#allocation5_spill] sm:$0xff] }
 0x1ee   : > { %v2756_v40 = vadd.f32 %v3667_v27, %v2590_v52  ;;  %v2758_v31 = vadd.f32 %v3667_v27, %v2616_v18  ;;  %v2656_v55 = vadd.f32 %v2120_v48, %v2088_v4  ;;  %v1847_v50 = vmax.f32 %v1513_v6, 0.0 }
 0x1ef   : > { %v2757_v23 = vadd.f32 %v3667_v27, %v2603_v39  ;;  %v2759_v42 = vadd.f32 %v3667_v27, %v2629_v20  ;;  %v1849_v29 = vmax.f32 %v1586_v60, 0.0  ;;  %v1515_v59 = vadd.f32 %v5027_v58, %v3637_v56 }
 0x1f0   : > { %v2643_v3 = vadd.f32 %v2119_v32, %v2087_v36  ;;  %v2669_v37 = vadd.f32 %v2121_v35, %v2089_v9  ;;  %v2150_v34 = vmul.f32 %v3661_v17, %v1846_v11  ;;  %v1588_v4 = vadd.f32 %v5028_v1, %v3637_v56  ;;  %v4697_v9 = vpop.f32.mrf.mxu0  ;;  %v4704_v11 = vpop.f32.mrf.mxu1 }
 0x1f1   : > { %v2900_v48 = vcombine.low %v2756_v40, %v2757_v23  ;;  %v2901_v52 = vcombine.low %v2758_v31, %v2759_v42  ;;  %v2152_v30 = vmul.f32 %v3661_v17, %v1848_v45  ;;  %v1878_v39 = vmax.f32 %v1515_v59, 0.0 }
 0x1f2   : > { %v2151_v20 = vmul.f32 %v3661_v17, %v1847_v50  ;;  %v1880_v41 = vmax.f32 %v1588_v4, 0.0  ;;  %v1517_v6 = vadd.f32 %v4526_v14, %v3637_v56  ;;  %v1590_v36 = vadd.f32 %v4530_v15, %v3637_v56  ;;  %v4712_v1 = vpop.f32.mrf.mxu0 }
 0x1f3   : > { %v2922_v32 = vrot.slane %v2900_v48, %v3669_v28  ;;  %v2929_v18 = vrot.slane %v2901_v52, %v3669_v28  ;;  %v2153_v35 = vmul.f32 %v3661_v17, %v1849_v29  ;;  %v1521_v45 = vadd.f32 %v4540_v38, %v3656_v8 }
 0x1f4   : > { %v2182_v50 = vmul.f32 %v3686_v44, %v1878_v39  ;;  %v2184_v14 = vmul.f32 %v3686_v44, %v1880_v41  ;;  %v1879_v60 = vmax.f32 %v1517_v6, 0.0  ;;  %v1594_v15 = vadd.f32 %v4547_v53, %v3656_v8  ;;  %v4718_v39 = vpop.f32.mrf.mxu1 }
 0x1f5   : > { %v2931_v40 = vcombine.low %v2922_v32, %v2929_v18  ;;  %v1881_v31 = vmax.f32 %v1590_v36, 0.0  ;;  %v1910_v23 = vmax.f32 %v1521_v45, 0.0  ;;  %v1523_v42 = vadd.f32 %v4564_v49, %v3656_v8  ;;  %v4730_v32 = vpop.f32.mrf.mxu0 }
 0x1f6   : > { %v2631_v29 = vadd.f32 %v2630_v47, %v2150_v34  ;;  %v2657_v58 = vadd.f32 %v2656_v55, %v2152_v30  ;;  %v2644_v59 = vadd.f32 %v2643_v3, %v2151_v20  ;;  %v1912_v38 = vmax.f32 %v1594_v15, 0.0  ;;  %v4738_v45 = vpop.f32.mrf.mxu1 }
 0x1f7   : > { %v2945_v4 = vrot.slane %v2931_v40, %v3669_v28  ;;  %v2183_v48 = vmul.f32 %v3686_v44, %v1879_v60  ;;  %v1911_v52 = vmax.f32 %v1523_v42, 0.0  ;;  %v1596_v53 = vadd.f32 %v4568_v62, %v3656_v8 }
 0x1f8   : > { %v2670_v41 = vadd.f32 %v2669_v37, %v2153_v35  ;;  %v2632_v6 = vadd.f32 %v2631_v29, %v2182_v50  ;;  %v2658_v49 = vadd.f32 %v2657_v58, %v2184_v14  ;;  %v1525_v55 = vadd.f32 %v4578_v19, %v3674_v33  ;;  %v4746_v29 = vpop.f32.mrf.mxu0 }
 0x1f9   : > { %v2946_v47 = vcombine.low %v4638_v61, %v2945_v4  ;;  %v2185_v3 = vmul.f32 %v3686_v44, %v1881_v31  ;;  %v2214_v34 = vmul.f32 %v3705_v24, %v1910_v23  ;;  %v1913_v30 = vmax.f32 %v1596_v53, 0.0  ;;  %v4752_v4 = vpop.f32.mrf.mxu1 }
 0x1fa   : > { %v2216_v20 = vmul.f32 %v3705_v24, %v1912_v38  ;;  %v1942_v36 = vmax.f32 %v1525_v55, 0.0  ;;  %v1598_v62 = vadd.f32 %v4585_v10, %v3674_v33  ;;  %v1527_v37 = vadd.f32 %v4598_v16, %v3674_v33 }
 0x1fb   : > { %3002 = vst [vmem:[%s3983_s13 + $0x10] sm:$0xff] %v2946_v47  ;;  %v2645_v19 = vadd.f32 %v2644_v59, %v2183_v48  ;;  %v2215_v61 = vmul.f32 %v3705_v24, %v1911_v52  ;;  %v1600_v18 = vadd.f32 %v4601_v5, %v3674_v33  ;;  %v1531_v35 = vadd.f32 %v4611_v21, %v3697_v12 }
 0x1fc   : > { %v2217_v50 = vmul.f32 %v3705_v24, %v1913_v30  ;;  %v1944_v10 = vmax.f32 %v1598_v62, 0.0  ;;  %v1943_v14 = vmax.f32 %v1527_v37, 0.0  ;;  %v1604_v16 = vadd.f32 %v4618_v54, %v3697_v12  ;;  %v5030_v37 = vld [vmem:[#allocation18_spill] sm:$0xff] }
 0x1fd   : > { %v2246_v60 = vmul.f32 %v3725_v7, %v1942_v36  ;;  %v1945_v15 = vmax.f32 %v1600_v18, 0.0  ;;  %v1974_v40 = vmax.f32 %v1531_v35, 0.0  ;;  %v1533_v31 = vadd.f32 %v4628_v46, %v3697_v12  ;;  %v5031_v35 = vld [vmem:[#allocation10_spill] sm:$0xff] }
 0x1fe   : > { %v2671_v5 = vadd.f32 %v2670_v41, %v2185_v3  ;;  %v2633_v23 = vadd.f32 %v2632_v6, %v2214_v34  ;;  %v2659_v42 = vadd.f32 %v2658_v49, %v2216_v20  ;;  %v1976_v21 = vmax.f32 %v1604_v16, 0.0  ;;  %v5029_v34 = vld [vmem:[#allocation17_spill] sm:$0xff]  ;;  %v4764_v20 = vpop.f32.mrf.mxu0 }
 0x1ff   : > { %v2248_v58 = vmul.f32 %v3725_v7, %v1944_v10  ;;  %v2247_v59 = vmul.f32 %v3725_v7, %v1943_v14  ;;  %v1975_v38 = vmax.f32 %v1533_v31, 0.0  ;;  %v1606_v54 = vadd.f32 %v4632_v57, %v3697_v12 }
 0x200   : > { %v2646_v48 = vadd.f32 %v2645_v19, %v2215_v61  ;;  %v2672_v52 = vadd.f32 %v2671_v5, %v2217_v50  ;;  %v2278_v46 = vmul.f32 %v4972_v22, %v1974_v40  ;;  %v1535_v53 = vadd.f32 %v4646_v26, %v3719_v51  ;;  %v4769_v61 = vpop.f32.mrf.mxu1 }
 0x201   : > { %v2634_v41 = vadd.f32 %v2633_v23, %v2246_v60  ;;  %v2249_v6 = vmul.f32 %v3725_v7, %v1945_v15  ;;  %v2280_v49 = vmul.f32 %v4972_v22, %v1976_v21  ;;  %v1977_v55 = vmax.f32 %v1606_v54, 0.0  ;;  %v4774_v23 = vpop.f32.mrf.mxu0 }
 0x202   : > { %v2279_v47 = vmul.f32 %v4972_v22, %v1975_v38  ;;  %v2006_v3 = vmax.f32 %v1535_v53, 0.0  ;;  %v1608_v57 = vadd.f32 %v4650_v25, %v3719_v51  ;;  %v1537_v30 = vadd.f32 %v5029_v34, %v3719_v51 }
 0x203   : > { %v2660_v36 = vadd.f32 %v2659_v42, %v2248_v58  ;;  %v2647_v62 = vadd.f32 %v2646_v48, %v2247_v59  ;;  %v2281_v26 = vmul.f32 %v4972_v22, %v1977_v55  ;;  %v1610_v19 = vadd.f32 %v5030_v37, %v3719_v51  ;;  %v4777_v58 = vpop.f32.mrf.mxu1  ;;  %v5034_v55 = vld [vmem:[#allocation6_spill] sm:$0xff] }
 0x204   : > { %v2635_v18 = vadd.f32 %v2634_v41, %v2278_v46  ;;  %v2310_v50 = vmul.f32 %v5031_v35, %v2006_v3  ;;  %v2008_v10 = vmax.f32 %v1608_v57, 0.0  ;;  %v2007_v14 = vmax.f32 %v1537_v30, 0.0  ;;  %v5033_v46 = vld [vmem:[#allocation19_spill] sm:$0xff]  ;;  %v4781_v41 = vpop.f32.mrf.mxu0 }
 0x205   : > { %v2673_v25 = vadd.f32 %v2672_v52, %v2249_v6  ;;  %v2661_v16 = vadd.f32 %v2660_v36, %v2280_v49  ;;  %v2009_v60 = vmax.f32 %v1610_v19, 0.0  ;;  %v2648_v15 = vadd.f32 %v2647_v62, %v2279_v47  ;;  %v5032_v52 = vld [vmem:[#allocation4_spill] sm:$0xff]  ;;  %v4787_v3 = vpop.f32.mrf.mxu1 }
 0x206   : > { %v2636_v40 = vadd.f32 %v2635_v18, %v2310_v50  ;;  %v2312_v31 = vmul.f32 %v5031_v35, %v2008_v10  ;;  %v2311_v5 = vmul.f32 %v5031_v35, %v2007_v14  ;;  %v1647_v53 = vadd.f32 %v5033_v46, %v5032_v52  ;;  %v4797_v19 = vpop.f32.mrf.mxu0 }
 0x207   : > { %v2674_v42 = vadd.f32 %v2673_v25, %v2281_v26  ;;  %v2313_v21 = vmul.f32 %v5031_v35, %v2009_v60  ;;  %v1720_v49 = vadd.f32 %v4673_v13, %v5032_v52  ;;  %v1651_v47 = vadd.f32 %v4697_v9, %v5034_v55  ;;  %v4799_v10 = vpop.f32.mrf.mxu1 }
 0x208   : > { %v2662_v59 = vadd.f32 %v2661_v16, %v2312_v31  ;;  %v2649_v38 = vadd.f32 %v2648_v15, %v2311_v5  ;;  %v2637_v48 = vrot.slane %v2636_v40, 4  ;;  %v1649_v34 = vadd.f32 %v4680_v0, %v5032_v52 }
 0x209   : > { %v2675_v54 = vadd.f32 %v2674_v42, %v2313_v21  ;;  %v1722_v30 = vadd.f32 %v4686_v43, %v5032_v52  ;;  %v1724_v36 = vadd.f32 %v4704_v11, %v5034_v55  ;;  %v1786_v37 = vmax.f32 %v1647_v53, 0.0  ;;  %v4808_v42 = vpop.f32.mrf.mxu0 }
 0x20a   : > { %v2663_v6 = vrot.slane %v2662_v59, 4  ;;  %v2650_v57 = vrot.slane %v2649_v38, 4  ;;  %v2638_v26 = vadd.f32 %v2637_v48, %v2636_v40  ;;  %v1653_v13 = vadd.f32 %v4712_v1, %v5034_v55  ;;  %v5035_v1 = vld [vmem:[#allocation7_spill] sm:$0xff] }
 0x20b   : > { %v2676_v62 = vrot.slane %v2675_v54, 4  ;;  %v1788_v18 = vmax.f32 %v1720_v49, 0.0  ;;  %v1818_v50 = vmax.f32 %v1651_v47, 0.0  ;;  %v1787_v14 = vmax.f32 %v1649_v34, 0.0  ;;  %v1672_v34 = vpop.f32.mrf.mxu0 }
 0x20c   : > { %v2664_v9 = vadd.f32 %v2663_v6, %v2662_v59  ;;  %v2651_v0 = vadd.f32 %v2650_v57, %v2649_v38  ;;  %v1789_v25 = vmax.f32 %v1722_v30, 0.0  ;;  %v1820_v43 = vmax.f32 %v1724_v36, 0.0 }
 0x20d   : > { %v2677_v16 = vadd.f32 %v2676_v62, %v2675_v54  ;;  %v1726_v11 = vadd.f32 %v4718_v39, %v5034_v55  ;;  %v1657_v60 = vadd.f32 %v4730_v32, %v4999_v2  ;;  %v2639_v15 = vrot.slane %v2638_v26, 2  ;;  %v1743_v54 = vpop.f32.mrf.mxu1 }
 0x20e   : > { %v2090_v40 = vmul.f32 %v5035_v1, %v1786_v37  ;;  %v1819_v31 = vmax.f32 %v1653_v13, 0.0  ;;  %v1730_v5 = vadd.f32 %v4738_v45, %v4999_v2  ;;  %v2665_v21 = vrot.slane %v2664_v9, 2 }
 0x20f   : > { %v2092_v59 = vmul.f32 %v5035_v1, %v1788_v18  ;;  %v2122_v38 = vmul.f32 %v5021_v63, %v1818_v50  ;;  %v1659_v39 = vadd.f32 %v4746_v29, %v4999_v2  ;;  %v2652_v48 = vrot.slane %v2651_v0, 2  ;;  %v1745_v13 = vpop.f32.mrf.mxu1 }
 0x210   : > { %v2091_v32 = vmul.f32 %v5035_v1, %v1787_v14  ;;  %v2093_v52 = vmul.f32 %v5035_v1, %v1789_v25  ;;  %v2124_v46 = vmul.f32 %v5021_v63, %v1820_v43  ;;  %v2678_v53 = vrot.slane %v2677_v16, 2 }
 0x211   : > { %v1821_v45 = vmax.f32 %v1726_v11, 0.0  ;;  %v1850_v6 = vmax.f32 %v1657_v60, 0.0  ;;  %v1732_v49 = vadd.f32 %v4752_v4, %v4999_v2  ;;  %v4819_v55 = vadd.f32 %v2639_v15, %v2638_v26  ;;  %v1676_v60 = vpop.f32.mrf.mxu0  ;;  %v1749_v1 = vpop.f32.mrf.mxu1 }
 0x212   : > { %v2123_v47 = vmul.f32 %v5021_v63, %v1819_v31  ;;  %v1852_v57 = vmax.f32 %v1730_v5, 0.0  ;;  %v1661_v29 = vadd.f32 %v4764_v20, %v3637_v56  ;;  %v4824_v30 = vadd.f32 %v2665_v21, %v2664_v9 }
 0x213   : > { %v2682_v36 = vadd.f32 %v2122_v38, %v2090_v40  ;;  %v1851_v62 = vmax.f32 %v1659_v39, 0.0  ;;  %v1853_v37 = vmax.f32 %v1732_v49, 0.0  ;;  %v4826_v18 = vadd.f32 %v2652_v48, %v2651_v0  ;;  %v1678_v48 = vpop.f32.mrf.mxu0 }
 0x214   : > { %v2708_v50 = vadd.f32 %v2124_v46, %v2092_v59  ;;  %v1882_v14 = vmax.f32 %v1661_v29, 0.0  ;;  %v1734_v2 = vadd.f32 %v4769_v61, %v3637_v56  ;;  %v4830_v4 = vadd.f32 %v2678_v53, %v2677_v16 }
 0x215   : > { %v2125_v26 = vmul.f32 %v5021_v63, %v1821_v45  ;;  %v2154_v20 = vmul.f32 %v3661_v17, %v1850_v6  ;;  %v1663_v9 = vadd.f32 %v4774_v23, %v3637_v56  ;;  %v2695_v25 = vadd.f32 %v2123_v47, %v2091_v32  ;;  %v1751_v6 = vpop.f32.mrf.mxu1 }
 0x216   : > { %v2156_v43 = vmul.f32 %v3661_v17, %v1852_v57  ;;  %v1884_v11 = vmax.f32 %v1734_v2, 0.0  ;;  %v1736_v0 = vadd.f32 %v4777_v58, %v3637_v56  ;;  %v2155_v15 = vmul.f32 %v3661_v17, %v1851_v62 }
 0x217   : > { %v2157_v61 = vmul.f32 %v3661_v17, %v1853_v37  ;;  %v2186_v16 = vmul.f32 %v3686_v44, %v1882_v14  ;;  %v1667_v63 = vadd.f32 %v4781_v41, %v3656_v8  ;;  %v2654_v23 = vrot.slane %v4826_v18, 1 }
 0x218   : > { %v1883_v40 = vmax.f32 %v1663_v9, 0.0  ;;  %v1885_v31 = vmax.f32 %v1736_v0, 0.0  ;;  %v1740_v5 = vadd.f32 %v4787_v3, %v3656_v8  ;;  %v2721_v21 = vadd.f32 %v2125_v26, %v2093_v52  ;;  %v1753_v26 = vpop.f32.mrf.mxu1 }
 0x219   : > { %v2683_v56 = vadd.f32 %v2682_v36, %v2154_v20  ;;  %v1914_v58 = vmax.f32 %v1667_v63, 0.0  ;;  %v1669_v59 = vadd.f32 %v4797_v19, %v3656_v8  ;;  %v2709_v17 = vadd.f32 %v2708_v50, %v2156_v43  ;;  %v1680_v50 = vpop.f32.mrf.mxu0 }
 0x21a   : > { %v2188_v38 = vmul.f32 %v3686_v44, %v1884_v11  ;;  %v1916_v39 = vmax.f32 %v1740_v5, 0.0  ;;  %v1742_v41 = vadd.f32 %v4799_v10, %v3656_v8  ;;  %v2696_v32 = vadd.f32 %v2695_v25, %v2155_v15 }
 0x21b   : > { %v2722_v46 = vadd.f32 %v2721_v21, %v2157_v61  ;;  %v2684_v53 = vadd.f32 %v2683_v56, %v2186_v16  ;;  %v1915_v45 = vmax.f32 %v1669_v59, 0.0  ;;  %v2187_v3 = vmul.f32 %v3686_v44, %v1883_v40  ;;  %v1682_v61 = vpop.f32.mrf.mxu0 }
 0x21c   : > { %v2189_v52 = vmul.f32 %v3686_v44, %v1885_v31  ;;  %v1917_v49 = vmax.f32 %v1742_v41, 0.0  ;;  %v1671_v19 = vadd.f32 %v4808_v42, %v3674_v33  ;;  %v2218_v47 = vmul.f32 %v3705_v24, %v1914_v58  ;;  %v1755_v31 = vpop.f32.mrf.mxu1 }
 0x21d   : > { %v2220_v57 = vmul.f32 %v3705_v24, %v1916_v39  ;;  %v1744_v8 = vadd.f32 %v1743_v54, %v3674_v33  ;;  %v1673_v10 = vadd.f32 %v1672_v34, %v3674_v33  ;;  %v2710_v29 = vadd.f32 %v2709_v17, %v2188_v38 }
 0x21e   : > { %v2219_v36 = vmul.f32 %v3705_v24, %v1915_v45  ;;  %v1946_v62 = vmax.f32 %v1671_v19, 0.0  ;;  %v1746_v37 = vadd.f32 %v1745_v13, %v3674_v33  ;;  %v2221_v44 = vmul.f32 %v3705_v24, %v1917_v49 }
 0x21f   : > { %v1948_v14 = vmax.f32 %v1744_v8, 0.0  ;;  %v1947_v2 = vmax.f32 %v1673_v10, 0.0  ;;  %v1677_v42 = vadd.f32 %v1676_v60, %v3697_v12  ;;  %v2697_v20 = vadd.f32 %v2696_v32, %v2187_v3 }
 0x220   : > { %v2723_v9 = vadd.f32 %v2722_v46, %v2189_v52  ;;  %v1949_v25 = vmax.f32 %v1746_v37, 0.0  ;;  %v1750_v54 = vadd.f32 %v1749_v1, %v3697_v12  ;;  %v2685_v34 = vadd.f32 %v2684_v53, %v2218_v47 }
 0x221   : > { %v2711_v43 = vadd.f32 %v2710_v29, %v2220_v57  ;;  %v1978_v11 = vmax.f32 %v1677_v42, 0.0  ;;  %v1679_v0 = vadd.f32 %v1678_v48, %v3697_v12  ;;  %v2698_v15 = vadd.f32 %v2697_v20, %v2219_v36 }
 0x222   : > { %v2250_v33 = vmul.f32 %v3725_v7, %v1946_v62  ;;  %v1980_v13 = vmax.f32 %v1750_v54, 0.0  ;;  %v1752_v24 = vadd.f32 %v1751_v6, %v3697_v12  ;;  %v2724_v16 = vadd.f32 %v2723_v9, %v2221_v44 }
 0x223   : > { %v2252_v60 = vmul.f32 %v3725_v7, %v1948_v14  ;;  %v2251_v63 = vmul.f32 %v3725_v7, %v1947_v2  ;;  %v1979_v40 = vmax.f32 %v1679_v0, 0.0  ;;  %v2253_v1 = vmul.f32 %v3725_v7, %v1949_v25 }
 0x224   : > { %v2282_v5 = vmul.f32 %v4972_v22, %v1978_v11  ;;  %v1981_v21 = vmax.f32 %v1752_v24, 0.0  ;;  %v1681_v56 = vadd.f32 %v1680_v50, %v3719_v51  ;;  %v2284_v58 = vmul.f32 %v4972_v22, %v1980_v13 }
 0x225   : > { %v2283_v59 = vmul.f32 %v4972_v22, %v1979_v40  ;;  %v1754_v12 = vadd.f32 %v1753_v26, %v3719_v51  ;;  %v1683_v17 = vadd.f32 %v1682_v61, %v3719_v51  ;;  %v2686_v38 = vadd.f32 %v2685_v34, %v2250_v33 }
 0x226   : > { %v2285_v39 = vmul.f32 %v4972_v22, %v1981_v21  ;;  %v2010_v41 = vmax.f32 %v1681_v56, 0.0  ;;  %v1756_v48 = vadd.f32 %v1755_v31, %v3719_v51  ;;  %v2712_v7 = vadd.f32 %v2711_v43, %v2252_v60 }
 0x227   : > { %v2699_v32 = vadd.f32 %v2698_v15, %v2251_v63  ;;  %v2012_v46 = vmax.f32 %v1754_v12, 0.0  ;;  %v2011_v53 = vmax.f32 %v1683_v17, 0.0  ;;  %v2725_v45 = vadd.f32 %v2724_v16, %v2253_v1 }
 0x228   : > { %v2687_v6 = vadd.f32 %v2686_v38, %v2282_v5  ;;  %v2314_v3 = vmul.f32 %v5031_v35, %v2010_v41  ;;  %v2013_v52 = vmax.f32 %v1756_v48, 0.0  ;;  %v2713_v49 = vadd.f32 %v2712_v7, %v2284_v58 }
 0x229   : > { %v2700_v19 = vadd.f32 %v2699_v32, %v2283_v59  ;;  %v2316_v47 = vmul.f32 %v5031_v35, %v2012_v46  ;;  %v2315_v57 = vmul.f32 %v5031_v35, %v2011_v53  ;;  %v2680_v22 = vrot.slane %v4830_v4, 1 }
 0x22a   : > { %v2726_v8 = vadd.f32 %v2725_v45, %v2285_v39  ;;  %v2688_v10 = vadd.f32 %v2687_v6, %v2314_v3  ;;  %v2317_v51 = vmul.f32 %v5031_v35, %v2013_v52  ;;  %v2641_v62 = vrot.slane %v4819_v55, 1 }
 0x22b   : > { %v2714_v29 = vadd.f32 %v2713_v49, %v2316_v47  ;;  %v2701_v36 = vadd.f32 %v2700_v19, %v2315_v57  ;;  %v2667_v37 = vrot.slane %v4824_v30, 1  ;;  %v2655_v42 = vadd.f32 %v2654_v23, %v4826_v18 }
 0x22c   : > { %v2689_v50 = vrot.slane %v2688_v10, 4  ;;  %v2727_v44 = vadd.f32 %v2726_v8, %v2317_v51  ;;  %v2681_v26 = vadd.f32 %v2680_v22, %v4830_v4  ;;  %v2642_v54 = vadd.f32 %v2641_v62, %v4819_v55 }
 0x22d   : > { %v2715_v14 = vrot.slane %v2714_v29, 4  ;;  %v2702_v2 = vrot.slane %v2701_v36, 4  ;;  %v2668_v34 = vadd.f32 %v2667_v37, %v4824_v30  ;;  %v2761_v33 = vadd.f32 %v3667_v27, %v2655_v42 }
 0x22e   : > { %v2690_v20 = vadd.f32 %v2689_v50, %v2688_v10  ;;  %v2728_v9 = vrot.slane %v2727_v44, 4  ;;  %v2763_v13 = vadd.f32 %v3667_v27, %v2681_v26  ;;  %v2760_v61 = vadd.f32 %v3667_v27, %v2642_v54 }
 0x22f   : > { %v2716_v25 = vadd.f32 %v2715_v14, %v2714_v29  ;;  %v2703_v35 = vadd.f32 %v2702_v2, %v2701_v36  ;;  %v2762_v16 = vadd.f32 %v3667_v27, %v2668_v34 }
 0x230   : > { %v2691_v43 = vrot.slane %v2690_v20, 2  ;;  %v2729_v11 = vadd.f32 %v2728_v9, %v2727_v44  ;;  %v2947_v40 = vcombine.low %v2760_v61, %v2761_v33 }
 0x231   : > { %v2717_v0 = vrot.slane %v2716_v25, 2  ;;  %v2704_v15 = vrot.slane %v2703_v35, 2  ;;  %v2948_v31 = vcombine.low %v2762_v16, %v2763_v13 }
 0x232   : > { %v2692_v24 = vadd.f32 %v2691_v43, %v2690_v20  ;;  %v2730_v18 = vrot.slane %v2729_v11, 2  ;;  %v2957_v17 = vrot.slane %v2947_v40, %v3669_v28 }
 0x233   : > { %v2718_v23 = vadd.f32 %v2717_v0, %v2716_v25  ;;  %v2705_v4 = vadd.f32 %v2704_v15, %v2703_v35  ;;  %v2964_v38 = vrot.slane %v2948_v31, %v3669_v28 }
 0x234   : > { %v2693_v60 = vrot.slane %v2692_v24, 1  ;;  %v2731_v55 = vadd.f32 %v2730_v18, %v2729_v11 }
 0x235   : > { %v2719_v63 = vrot.slane %v2718_v23, 1  ;;  %v2706_v30 = vrot.slane %v2705_v4, 1  ;;  %v2979_v46 = vcombine.low %v2957_v17, %v2964_v38 }
 0x236   : > { %v2694_v1 = vadd.f32 %v2693_v60, %v2692_v24  ;;  %v2732_v5 = vrot.slane %v2731_v55, 1 }
 0x237   : > { %v2720_v21 = vadd.f32 %v2719_v63, %v2718_v23  ;;  %v2707_v56 = vadd.f32 %v2706_v30, %v2705_v4  ;;  %v2987_v6 = vrot.slane %v2979_v46, %v3669_v28 }
 0x238   : > { %v2733_v58 = vadd.f32 %v2732_v5, %v2731_v55  ;;  %v2764_v59 = vadd.f32 %v3667_v27, %v2694_v1 }
 0x239   : > { %v2765_v12 = vadd.f32 %v3667_v27, %v2707_v56  ;;  %v2766_v39 = vadd.f32 %v3667_v27, %v2720_v21 }
 0x23a   : > { %v2767_v41 = vadd.f32 %v3667_v27, %v2733_v58 }
 0x23b   : > { %v2949_v48 = vcombine.low %v2764_v59, %v2765_v12 }
 0x23c   : > { %v2950_v7 = vcombine.low %v2766_v39, %v2767_v41 }
 0x23d   : > { %v2971_v32 = vrot.slane %v2949_v48, %v3669_v28 }
 0x23e   : > { %v2978_v53 = vrot.slane %v2950_v7, %v3669_v28 }
 0x240   : > { %v2980_v45 = vcombine.low %v2971_v32, %v2978_v53 }
 0x242   : > { %v2994_v3 = vrot.slane %v2980_v45, %v3669_v28 }
 0x244   : > { %v2995_v52 = vcombine.low %v2987_v6, %v2994_v3 }
 0x246   : > { %3003 = vst [vmem:[%s3983_s13 + $0x18] sm:$0xff] %v2995_v52 }
 0x247 PF: > { %p13_p9 = scmp.ge.s32.totalorder %s3281_s23, 4   ;;  %s5036_s20 = smov %s3223_s21 }
 0x248   : > { %s5037_s21 = smov %s3290_s26  ;;  %s5038_s22 = smov %s3281_s23 }
 0x249   :  { %15 = sbr.rel (!%p13_p9) target bundleno = 4 (0x4), region = 98 }

</bundles_post_ra>
